<compile_context>
chip_gen: v7x
topology: tpu7x:2x2x1
jax: 0.10.0
libtpu: 0.0.40
codegen_flags: <defaults>
</compile_context>

<pallas_src>
import jax
import jax.numpy as jnp
from jax.experimental import pallas as pl
from jax.experimental.pallas import tpu as pltpu

# ---------------- small synthetic ViT-B/32-style config ----------------
IMG = 32          # image resolution (CLIP: 224)
PATCH = 8         # patch size       (CLIP: 32)
WIDTH = 32        # transformer width (CLIP: 768)
LAYERS = 2        # transformer layers (CLIP: 12)
HEADS = 4         # attention heads (CLIP: 12)
EMBED = 16        # visual output_dim (CLIP: 512)
OUT_DIM = 8       # out_feature_dim of the fc head
GRID_P = IMG // PATCH
N_PATCH = GRID_P * GRID_P
SEQ = N_PATCH + 1          # + class token  (= 17)
SEQ_PAD = 24               # padded to a multiple of 8 sublanes
DH = WIDTH // HEADS
PATCH_DIM = 3 * PATCH * PATCH
EPS = 1e-5
ATT_SCALE = 1.0 / (DH ** 0.5)
NEG_INF = -1e30


# ---------------- in-kernel helpers ----------------
def _ln(x, g, b):
    """LayerNorm in f32. x: (S, D); g, b: (1, D)."""
    mu = jnp.mean(x, axis=-1, keepdims=True)
    xc = x - mu
    var = jnp.mean(xc * xc, axis=-1, keepdims=True)
    return xc * jax.lax.rsqrt(var + EPS) * g + b


# ---------------- Pallas kernels ----------------
def _stem_kernel(patches_ref, convw_ref, addemb_ref, g_ref, b_ref, o_ref):
    # patch-embed conv (as matmul) + class/pos embedding add + ln_pre, one store.
    tok = jnp.dot(patches_ref[...], convw_ref[...],
                  preferred_element_type=jnp.float32)          # (SEQ_PAD, WIDTH)
    tok = tok + addemb_ref[...]
    o_ref[...] = _ln(tok, g_ref[...], b_ref[...])


def _layer_kernel(h_ref,
                  ln1g_ref, ln1b_ref, qkvw_ref, qkvb_ref, ow_ref, ob_ref,
                  ln2g_ref, ln2b_ref, fcw_ref, fcb_ref, pjw_ref, pjb_ref,
                  o_ref):
    """One full ResidualAttentionBlock for a single batch element."""
    x = h_ref[...]                                             # (SEQ_PAD, WIDTH) f32

    # ---- attention branch: LN1 -> QKV -> SDPA -> out-proj + residual ----
    xn = _ln(x, ln1g_ref[...], ln1b_ref[...])
    qkv = jnp.dot(xn.astype(jnp.bfloat16), qkvw_ref[...],
                  preferred_element_type=jnp.float32) + qkvb_ref[...]  # (SEQ_PAD, 3*WIDTH)

    # key-padding mask (rows >= SEQ are dummy padding)
    key_id = jax.lax.broadcasted_iota(jnp.int32, (SEQ_PAD, SEQ_PAD), 1)
    valid = key_id < SEQ

    # concat(heads) @ W_out == sum_h head_h @ W_out[h*Dh:(h+1)*Dh]  (no in-kernel concat)
    att_acc = jnp.zeros((SEQ_PAD, WIDTH), jnp.float32)
    for hh in range(HEADS):
        q = (qkv[:, hh * DH:(hh + 1) * DH] * ATT_SCALE).astype(jnp.bfloat16)
        k = qkv[:, WIDTH + hh * DH: WIDTH + (hh + 1) * DH].astype(jnp.bfloat16)
        v = qkv[:, 2 * WIDTH + hh * DH: 2 * WIDTH + (hh + 1) * DH].astype(jnp.bfloat16)
        s = jnp.dot(q, k.T, preferred_element_type=jnp.float32)   # (SEQ_PAD, SEQ_PAD)
        s = jnp.where(valid, s, NEG_INF)
        m = jnp.max(s, axis=-1, keepdims=True)
        p = jnp.exp(s - m)
        p = p * pl.reciprocal(jnp.sum(p, axis=-1, keepdims=True), approx=True)
        oh = jnp.dot(p.astype(jnp.bfloat16), v,
                     preferred_element_type=jnp.float32)          # (SEQ_PAD, DH)
        w_h = ow_ref[hh * DH:(hh + 1) * DH, :]                    # (DH, WIDTH) bf16
        att_acc = att_acc + jnp.dot(oh.astype(jnp.bfloat16), w_h,
                                    preferred_element_type=jnp.float32)
    h1 = x + att_acc + ob_ref[...]

    # ---- MLP branch: LN2 -> fc (+QuickGELU fused) -> proj + residual ----
    xn2 = _ln(h1, ln2g_ref[...], ln2b_ref[...])
    m1 = jnp.dot(xn2.astype(jnp.bfloat16), fcw_ref[...],
                 preferred_element_type=jnp.float32) + fcb_ref[...]
    m1 = m1 * jax.nn.sigmoid(1.702 * m1)                          # QuickGELU, fused epilogue
    o_ref[...] = h1 + jnp.dot(m1.astype(jnp.bfloat16), pjw_ref[...],
                              preferred_element_type=jnp.float32) + pjb_ref[...]


def _head_kernel(cls_ref, g_ref, b_ref, proj_ref, fcw_ref, fcb_ref, o_ref):
    # ln_post -> visual projection (no bias) -> fc head (+bias), one kernel.
    xn = _ln(cls_ref[...], g_ref[...], b_ref[...])
    feat = jnp.dot(xn.astype(jnp.bfloat16), proj_ref[...],
                   preferred_element_type=jnp.float32)            # (B, EMBED)
    # (PyTorch: img_feature.float() under no_grad — accumulation already f32 here)
    o_ref[...] = jnp.dot(feat.astype(jnp.bfloat16), fcw_ref[...],
                         preferred_element_type=jnp.float32) + fcb_ref[...]


# ---------------- pallas_call wrappers ----------------
def stem(padded_patches, conv_wT, add_emb, g, b):
    B = padded_patches.shape[0]
    return pl.pallas_call(
        _stem_kernel,
        out_shape=jax.ShapeDtypeStruct((B, SEQ_PAD, WIDTH), jnp.float32),
        grid=(B,),
        in_specs=[
            pl.BlockSpec((None, SEQ_PAD, PATCH_DIM), lambda i: (i, 0, 0)),
            pl.BlockSpec((PATCH_DIM, WIDTH), lambda i: (0, 0)),
            pl.BlockSpec((SEQ_PAD, WIDTH), lambda i: (0, 0)),
            pl.BlockSpec((1, WIDTH), lambda i: (0, 0)),
            pl.BlockSpec((1, WIDTH), lambda i: (0, 0)),
        ],
        out_specs=pl.BlockSpec((None, SEQ_PAD, WIDTH), lambda i: (i, 0, 0)),
        compiler_params=pltpu.CompilerParams(dimension_semantics=("parallel",)),
    )(padded_patches, conv_wT, add_emb, g, b)


def residual_block(h, lp):
    B = h.shape[0]

    def wspec(shape):
        return pl.BlockSpec(shape, lambda i: (0, 0))

    return pl.pallas_call(
        _layer_kernel,
        out_shape=jax.ShapeDtypeStruct((B, SEQ_PAD, WIDTH), jnp.float32),
        grid=(B,),
        in_specs=[
            pl.BlockSpec((None, SEQ_PAD, WIDTH), lambda i: (i, 0, 0)),
            wspec((1, WIDTH)), wspec((1, WIDTH)),                   # ln1
            wspec((WIDTH, 3 * WIDTH)), wspec((1, 3 * WIDTH)),       # qkv
            wspec((WIDTH, WIDTH)), wspec((1, WIDTH)),               # attn out-proj
            wspec((1, WIDTH)), wspec((1, WIDTH)),                   # ln2
            wspec((WIDTH, 4 * WIDTH)), wspec((1, 4 * WIDTH)),       # mlp fc
            wspec((4 * WIDTH, WIDTH)), wspec((1, WIDTH)),           # mlp proj
        ],
        out_specs=pl.BlockSpec((None, SEQ_PAD, WIDTH), lambda i: (i, 0, 0)),
        compiler_params=pltpu.CompilerParams(dimension_semantics=("parallel",)),
    )(h,
      lp["ln1_g"].reshape(1, WIDTH), lp["ln1_b"].reshape(1, WIDTH),
      lp["qkv_w"].astype(jnp.bfloat16), lp["qkv_b"].reshape(1, 3 * WIDTH),
      lp["attn_out_w"].astype(jnp.bfloat16), lp["attn_out_b"].reshape(1, WIDTH),
      lp["ln2_g"].reshape(1, WIDTH), lp["ln2_b"].reshape(1, WIDTH),
      lp["mlp_fc_w"].astype(jnp.bfloat16), lp["mlp_fc_b"].reshape(1, 4 * WIDTH),
      lp["mlp_proj_w"].astype(jnp.bfloat16), lp["mlp_proj_b"].reshape(1, WIDTH))


def head(cls_tok, g, b, proj, fc_w, fc_b):
    B = cls_tok.shape[0]
    return pl.pallas_call(
        _head_kernel,
        out_shape=jax.ShapeDtypeStruct((B, OUT_DIM), jnp.float32),
        grid=(1,),
        in_specs=[
            pl.BlockSpec((B, WIDTH), lambda i: (0, 0)),
            pl.BlockSpec((1, WIDTH), lambda i: (0, 0)),
            pl.BlockSpec((1, WIDTH), lambda i: (0, 0)),
            pl.BlockSpec((WIDTH, EMBED), lambda i: (0, 0)),
            pl.BlockSpec((EMBED, OUT_DIM), lambda i: (0, 0)),
            pl.BlockSpec((1, OUT_DIM), lambda i: (0, 0)),
        ],
        out_specs=pl.BlockSpec((B, OUT_DIM), lambda i: (0, 0)),
        compiler_params=pltpu.CompilerParams(dimension_semantics=("arbitrary",)),
    )(cls_tok, g, b, proj, fc_w, fc_b)


# ---------------- deterministic parameter init (synthetic, not a checkpoint) ----------------
def init_params():
    key = jax.random.PRNGKey(0)

    def nrm(k, shape, std=0.02):
        return (std * jax.random.normal(k, shape)).astype(jnp.float32)

    keys = iter(jax.random.split(key, 8 + LAYERS * 8 + 4))
    p = {
        "conv_w": nrm(next(keys), (WIDTH, 3, PATCH, PATCH)),   # Conv2d(3, W, PATCH, stride=PATCH, bias=False)
        "class_emb": nrm(next(keys), (WIDTH,)),
        "pos_emb": nrm(next(keys), (SEQ, WIDTH)),
        "ln_pre_g": jnp.ones((WIDTH,), jnp.float32),
        "ln_pre_b": jnp.zeros((WIDTH,), jnp.float32),
        "ln_post_g": jnp.ones((WIDTH,), jnp.float32),
        "ln_post_b": jnp.zeros((WIDTH,), jnp.float32),
        "proj": nrm(next(keys), (WIDTH, EMBED)),               # visual.proj (no bias)
        "fc_w": nrm(next(keys), (EMBED, OUT_DIM)),             # nn.Linear(output_dim, out_feature_dim)
        "fc_b": nrm(next(keys), (OUT_DIM,)),
        "layers": [],
    }
    for _ in range(LAYERS):
        p["layers"].append({
            "ln1_g": jnp.ones((WIDTH,), jnp.float32),
            "ln1_b": jnp.zeros((WIDTH,), jnp.float32),
            "qkv_w": nrm(next(keys), (WIDTH, 3 * WIDTH)),
            "qkv_b": nrm(next(keys), (3 * WIDTH,)),
            "attn_out_w": nrm(next(keys), (WIDTH, WIDTH)),
            "attn_out_b": nrm(next(keys), (WIDTH,)),
            "ln2_g": jnp.ones((WIDTH,), jnp.float32),
            "ln2_b": jnp.zeros((WIDTH,), jnp.float32),
            "mlp_fc_w": nrm(next(keys), (WIDTH, 4 * WIDTH)),
            "mlp_fc_b": nrm(next(keys), (4 * WIDTH,)),
            "mlp_proj_w": nrm(next(keys), (4 * WIDTH, WIDTH)),
            "mlp_proj_b": nrm(next(keys), (WIDTH,)),
        })
    return p


# ---------------- forward pass ----------------
def clip_linear_forward(params, x):
    """x: (B, 3, IMG, IMG) float32 NCHW (PyTorch convention). Returns (B, OUT_DIM) f32."""
    B = x.shape[0]

    # --- im2col for the stride==kernel patch conv (glue, stays in JAX) ---
    patches = x.reshape(B, 3, GRID_P, PATCH, GRID_P, PATCH)
    patches = patches.transpose(0, 2, 4, 1, 3, 5).reshape(B, N_PATCH, PATCH_DIM)
    # pad seq to SEQ_PAD: row 0 = class-token slot (zero patch), rows >= SEQ = padding.
    padded = jnp.zeros((B, SEQ_PAD, PATCH_DIM), jnp.float32)
    padded = padded.at[:, 1:1 + N_PATCH, :].set(patches)
    padded = padded.astype(jnp.bfloat16)

    conv_wT = params["conv_w"].reshape(WIDTH, PATCH_DIM).T.astype(jnp.bfloat16)
    # additive embedding: class_emb folded into row 0 (conv of a zero patch is 0),
    # positional embedding on real rows, zeros on padded rows.
    add_emb = jnp.zeros((SEQ_PAD, WIDTH), jnp.float32)
    add_emb = add_emb.at[0].set(params["class_emb"] + params["pos_emb"][0])
    add_emb = add_emb.at[1:SEQ].set(params["pos_emb"][1:])

    # --- stem: patch-embed + embeddings + ln_pre (one fused kernel) ---
    h = stem(padded, conv_wT, add_emb,
             params["ln_pre_g"].reshape(1, WIDTH), params["ln_pre_b"].reshape(1, WIDTH))

    # --- transformer: one fused kernel per ResidualAttentionBlock ---
    for lp in params["layers"]:
        h = residual_block(h, lp)

    # --- head: ln_post on class token + visual proj + fc (one fused kernel) ---
    cls_tok = h[:, 0, :]                                       # (B, WIDTH)
    y = head(cls_tok,
             params["ln_post_g"].reshape(1, WIDTH), params["ln_post_b"].reshape(1, WIDTH),
             params["proj"].astype(jnp.bfloat16),
             params["fc_w"].astype(jnp.bfloat16),
             params["fc_b"].reshape(1, OUT_DIM))
    return y

# TODO(synk): at real ViT-B/32 scale (WIDTH=768, SEQ~50, large batch), tile the fused
# layer kernel over (batch*seq) rows with an M-grid axis and re-derive tile sizes for
# v7x's 64 MiB VMEM; the per-head Python loop should become a single lane-dense batched
# score matmul.


if __name__ == "__main__":
    params = init_params()
    key = jax.random.PRNGKey(0)
    x = jax.random.normal(key, (2, 3, IMG, IMG), dtype=jnp.float32)  # NCHW like PyTorch
    fwd = jax.jit(clip_linear_forward)
    y = fwd(params, x)
    y = jax.block_until_ready(y)
    assert y.shape == (2, OUT_DIM) and y.dtype == jnp.float32
    assert bool(jnp.all(jnp.isfinite(y)))
    print("KERNEL_OK")
</pallas_src>

<mosaic_0001>
module attributes {stable_mosaic.version = 11 : i64} {
  func.func @_stem_kernel(%arg0: i32, %arg1: memref<1x24x192xbf16, #tpu.memory_space<vmem>>, %arg2: memref<192x32xbf16, #tpu.memory_space<vmem>>, %arg3: memref<24x32xf32, #tpu.memory_space<vmem>>, %arg4: memref<1x32xf32, #tpu.memory_space<vmem>>, %arg5: memref<1x32xf32, #tpu.memory_space<vmem>>, %arg6: memref<1x24x32xf32, #tpu.memory_space<vmem>>) attributes {dimension_semantics = [#tpu.dimension_semantics<parallel>], iteration_bounds = array<i64: 2>, scalar_prefetch = 0 : i64, scratch_operands = 0 : i64, tpu.core_type = #tpu.core_type<tc>, window_params = [{transform_indices = @transform_0, window_bounds = array<i64: 1, 24, 192>}, {pipeline_mode = #tpu.pipeline_mode<synchronous>, transform_indices = @transform_1, window_bounds = array<i64: 192, 32>}, {pipeline_mode = #tpu.pipeline_mode<synchronous>, transform_indices = @transform_2, window_bounds = array<i64: 24, 32>}, {pipeline_mode = #tpu.pipeline_mode<synchronous>, transform_indices = @transform_3, window_bounds = array<i64: 1, 32>}, {pipeline_mode = #tpu.pipeline_mode<synchronous>, transform_indices = @transform_4, window_bounds = array<i64: 1, 32>}, {transform_indices = @transform_5, window_bounds = array<i64: 1, 24, 32>}]} {
    %c0 = arith.constant 0 : index
    %c0_0 = arith.constant 0 : index
    %c0_1 = arith.constant 0 : index
    %0 = vector.load %arg1[%c0, %c0_0, %c0_1] : memref<1x24x192xbf16, #tpu.memory_space<vmem>>, vector<1x24x192xbf16>
    %1 = vector.shape_cast %0 : vector<1x24x192xbf16> to vector<24x192xbf16>
    %c0_2 = arith.constant 0 : index
    %c0_3 = arith.constant 0 : index
    %2 = vector.load %arg2[%c0_2, %c0_3] : memref<192x32xbf16, #tpu.memory_space<vmem>>, vector<192x32xbf16>
    %cst = arith.constant dense<0.000000e+00> : vector<24x32xf32>
    %3 = tpu.matmul %1, %2, %cst {dimension_numbers = #tpu.dot_dimension_numbers<[1], [0], [0], [1], [0, 0, 1, 1], [], []>} : vector<24x192xbf16>, vector<192x32xbf16>, vector<24x32xf32> -> vector<24x32xf32>
    %c0_4 = arith.constant 0 : index
    %c0_5 = arith.constant 0 : index
    %4 = vector.load %arg3[%c0_4, %c0_5] : memref<24x32xf32, #tpu.memory_space<vmem>>, vector<24x32xf32>
    %5 = arith.addf %3, %4 : vector<24x32xf32>
    %c0_6 = arith.constant 0 : index
    %c0_7 = arith.constant 0 : index
    %6 = vector.load %arg4[%c0_6, %c0_7] : memref<1x32xf32, #tpu.memory_space<vmem>>, vector<1x32xf32>
    %c0_8 = arith.constant 0 : index
    %c0_9 = arith.constant 0 : index
    %7 = vector.load %arg5[%c0_8, %c0_9] : memref<1x32xf32, #tpu.memory_space<vmem>>, vector<1x32xf32>
    %cst_10 = arith.constant dense<0.000000e+00> : vector<24xf32>
    %8 = vector.multi_reduction <add>, %5, %cst_10 [1] : vector<24x32xf32> to vector<24xf32>
    %9 = vector.shape_cast %8 : vector<24xf32> to vector<24x1xf32>
    %cst_11 = arith.constant 3.200000e+01 : f32
    %10 = vector.broadcast %cst_11 : f32 to vector<24x1xf32>
    %11 = arith.divf %9, %10 : vector<24x1xf32>
    %12 = vector.broadcast %11 : vector<24x1xf32> to vector<24x32xf32>
    %13 = arith.subf %5, %12 : vector<24x32xf32>
    %14 = arith.mulf %13, %13 : vector<24x32xf32>
    %cst_12 = arith.constant dense<0.000000e+00> : vector<24xf32>
    %15 = vector.multi_reduction <add>, %14, %cst_12 [1] : vector<24x32xf32> to vector<24xf32>
    %16 = vector.shape_cast %15 : vector<24xf32> to vector<24x1xf32>
    %cst_13 = arith.constant 3.200000e+01 : f32
    %17 = vector.broadcast %cst_13 : f32 to vector<24x1xf32>
    %18 = arith.divf %16, %17 : vector<24x1xf32>
    %cst_14 = arith.constant 9.99999974E-6 : f32
    %19 = vector.broadcast %cst_14 : f32 to vector<24x1xf32>
    %20 = arith.addf %18, %19 : vector<24x1xf32>
    %21 = math.rsqrt %20 : vector<24x1xf32>
    %22 = vector.broadcast %21 : vector<24x1xf32> to vector<24x32xf32>
    %23 = arith.mulf %13, %22 : vector<24x32xf32>
    %24 = vector.broadcast %6 : vector<1x32xf32> to vector<24x32xf32>
    %25 = arith.mulf %23, %24 : vector<24x32xf32>
    %26 = vector.broadcast %7 : vector<1x32xf32> to vector<24x32xf32>
    %27 = arith.addf %25, %26 : vector<24x32xf32>
    %c0_15 = arith.constant 0 : index
    %c0_16 = arith.constant 0 : index
    %c0_17 = arith.constant 0 : index
    %28 = vector.load %arg6[%c0_15, %c0_16, %c0_17] : memref<1x24x32xf32, #tpu.memory_space<vmem>>, vector<1x24x32xf32>
    %29 = vector.shape_cast %28 : vector<1x24x32xf32> to vector<24x32xf32>
    %30 = vector.shape_cast %27 : vector<24x32xf32> to vector<1x24x32xf32>
    tpu.vector_store %arg6[%c0_15, %c0_16, %c0_17], %30 {strides = array<i32>} : memref<1x24x32xf32, #tpu.memory_space<vmem>>, vector<1x24x32xf32>,
    return
  }
  func.func @transform_0(%arg0: i32) -> (i32, i32, i32) {
    %c0_i32 = arith.constant 0 : i32
    %c0_i32_0 = arith.constant 0 : i32
    %c0_i32_1 = arith.constant 0 : i32
    return %arg0, %c0_i32, %c0_i32_0 : i32, i32, i32
  }
  func.func @transform_1(%arg0: i32) -> (i32, i32) {
    %c0_i32 = arith.constant 0 : i32
    %c0_i32_0 = arith.constant 0 : i32
    %c0_i32_1 = arith.constant 0 : i32
    return %c0_i32, %c0_i32_0 : i32, i32
  }
  func.func @transform_2(%arg0: i32) -> (i32, i32) {
    %c0_i32 = arith.constant 0 : i32
    %c0_i32_0 = arith.constant 0 : i32
    %c0_i32_1 = arith.constant 0 : i32
    return %c0_i32, %c0_i32_0 : i32, i32
  }
  func.func @transform_3(%arg0: i32) -> (i32, i32) {
    %c0_i32 = arith.constant 0 : i32
    %c0_i32_0 = arith.constant 0 : i32
    %c0_i32_1 = arith.constant 0 : i32
    return %c0_i32, %c0_i32_0 : i32, i32
  }
  func.func @transform_4(%arg0: i32) -> (i32, i32) {
    %c0_i32 = arith.constant 0 : i32
    %c0_i32_0 = arith.constant 0 : i32
    %c0_i32_1 = arith.constant 0 : i32
    return %c0_i32, %c0_i32_0 : i32, i32
  }
  func.func @transform_5(%arg0: i32) -> (i32, i32, i32) {
    %c0_i32 = arith.constant 0 : i32
    %c0_i32_0 = arith.constant 0 : i32
    %c0_i32_1 = arith.constant 0 : i32
    return %arg0, %c0_i32, %c0_i32_0 : i32, i32, i32
  }
}

module attributes {stable_mosaic.version = 11 : i64} {
  func.func @_layer_kernel(%arg0: i32, %arg1: memref<1x24x32xf32, #tpu.memory_space<vmem>>, %arg2: memref<1x32xf32, #tpu.memory_space<vmem>>, %arg3: memref<1x32xf32, #tpu.memory_space<vmem>>, %arg4: memref<32x96xbf16, #tpu.memory_space<vmem>>, %arg5: memref<1x96xf32, #tpu.memory_space<vmem>>, %arg6: memref<32x32xbf16, #tpu.memory_space<vmem>>, %arg7: memref<1x32xf32, #tpu.memory_space<vmem>>, %arg8: memref<1x32xf32, #tpu.memory_space<vmem>>, %arg9: memref<1x32xf32, #tpu.memory_space<vmem>>, %arg10: memref<32x128xbf16, #tpu.memory_space<vmem>>, %arg11: memref<1x128xf32, #tpu.memory_space<vmem>>, %arg12: memref<128x32xbf16, #tpu.memory_space<vmem>>, %arg13: memref<1x32xf32, #tpu.memory_space<vmem>>, %arg14: memref<1x24x32xf32, #tpu.memory_space<vmem>>) attributes {dimension_semantics = [#tpu.dimension_semantics<parallel>], iteration_bounds = array<i64: 2>, scalar_prefetch = 0 : i64, scratch_operands = 0 : i64, tpu.core_type = #tpu.core_type<tc>, window_params = [{transform_indices = @transform_0, window_bounds = array<i64: 1, 24, 32>}, {pipeline_mode = #tpu.pipeline_mode<synchronous>, transform_indices = @transform_1, window_bounds = array<i64: 1, 32>}, {pipeline_mode = #tpu.pipeline_mode<synchronous>, transform_indices = @transform_2, window_bounds = array<i64: 1, 32>}, {pipeline_mode = #tpu.pipeline_mode<synchronous>, transform_indices = @transform_3, window_bounds = array<i64: 32, 96>}, {pipeline_mode = #tpu.pipeline_mode<synchronous>, transform_indices = @transform_4, window_bounds = array<i64: 1, 96>}, {pipeline_mode = #tpu.pipeline_mode<synchronous>, transform_indices = @transform_5, window_bounds = array<i64: 32, 32>}, {pipeline_mode = #tpu.pipeline_mode<synchronous>, transform_indices = @transform_6, window_bounds = array<i64: 1, 32>}, {pipeline_mode = #tpu.pipeline_mode<synchronous>, transform_indices = @transform_7, window_bounds = array<i64: 1, 32>}, {pipeline_mode = #tpu.pipeline_mode<synchronous>, transform_indices = @transform_8, window_bounds = array<i64: 1, 32>}, {pipeline_mode = #tpu.pipeline_mode<synchronous>, transform_indices = @transform_9, window_bounds = array<i64: 32, 128>}, {pipeline_mode = #tpu.pipeline_mode<synchronous>, transform_indices = @transform_10, window_bounds = array<i64: 1, 128>}, {pipeline_mode = #tpu.pipeline_mode<synchronous>, transform_indices = @transform_11, window_bounds = array<i64: 128, 32>}, {pipeline_mode = #tpu.pipeline_mode<synchronous>, transform_indices = @transform_12, window_bounds = array<i64: 1, 32>}, {transform_indices = @transform_13, window_bounds = array<i64: 1, 24, 32>}]} {
    %c0 = arith.constant 0 : index
    %c0_0 = arith.constant 0 : index
    %c0_1 = arith.constant 0 : index
    %0 = vector.load %arg1[%c0, %c0_0, %c0_1] : memref<1x24x32xf32, #tpu.memory_space<vmem>>, vector<1x24x32xf32>
    %1 = vector.shape_cast %0 : vector<1x24x32xf32> to vector<24x32xf32>
    %c0_2 = arith.constant 0 : index
    %c0_3 = arith.constant 0 : index
    %2 = vector.load %arg2[%c0_2, %c0_3] : memref<1x32xf32, #tpu.memory_space<vmem>>, vector<1x32xf32>
    %c0_4 = arith.constant 0 : index
    %c0_5 = arith.constant 0 : index
    %3 = vector.load %arg3[%c0_4, %c0_5] : memref<1x32xf32, #tpu.memory_space<vmem>>, vector<1x32xf32>
    %cst = arith.constant dense<0.000000e+00> : vector<24xf32>
    %4 = vector.multi_reduction <add>, %1, %cst [1] : vector<24x32xf32> to vector<24xf32>
    %5 = vector.shape_cast %4 : vector<24xf32> to vector<24x1xf32>
    %cst_6 = arith.constant 3.200000e+01 : f32
    %6 = vector.broadcast %cst_6 : f32 to vector<24x1xf32>
    %7 = arith.divf %5, %6 : vector<24x1xf32>
    %8 = vector.broadcast %7 : vector<24x1xf32> to vector<24x32xf32>
    %9 = arith.subf %1, %8 : vector<24x32xf32>
    %10 = arith.mulf %9, %9 : vector<24x32xf32>
    %cst_7 = arith.constant dense<0.000000e+00> : vector<24xf32>
    %11 = vector.multi_reduction <add>, %10, %cst_7 [1] : vector<24x32xf32> to vector<24xf32>
    %12 = vector.shape_cast %11 : vector<24xf32> to vector<24x1xf32>
    %cst_8 = arith.constant 3.200000e+01 : f32
    %13 = vector.broadcast %cst_8 : f32 to vector<24x1xf32>
    %14 = arith.divf %12, %13 : vector<24x1xf32>
    %cst_9 = arith.constant 9.99999974E-6 : f32
    %15 = vector.broadcast %cst_9 : f32 to vector<24x1xf32>
    %16 = arith.addf %14, %15 : vector<24x1xf32>
    %17 = math.rsqrt %16 : vector<24x1xf32>
    %18 = vector.broadcast %17 : vector<24x1xf32> to vector<24x32xf32>
    %19 = arith.mulf %9, %18 : vector<24x32xf32>
    %20 = vector.broadcast %2 : vector<1x32xf32> to vector<24x32xf32>
    %21 = arith.mulf %19, %20 : vector<24x32xf32>
    %22 = vector.broadcast %3 : vector<1x32xf32> to vector<24x32xf32>
    %23 = arith.addf %21, %22 : vector<24x32xf32>
    %24 = arith.truncf %23 : vector<24x32xf32> to vector<24x32xbf16>
    %c0_10 = arith.constant 0 : index
    %c0_11 = arith.constant 0 : index
    %25 = vector.load %arg4[%c0_10, %c0_11] : memref<32x96xbf16, #tpu.memory_space<vmem>>, vector<32x96xbf16>
    %cst_12 = arith.constant dense<0.000000e+00> : vector<24x96xf32>
    %26 = tpu.matmul %24, %25, %cst_12 {dimension_numbers = #tpu.dot_dimension_numbers<[1], [0], [0], [1], [0, 0, 1, 1], [], []>} : vector<24x32xbf16>, vector<32x96xbf16>, vector<24x96xf32> -> vector<24x96xf32>
    %c0_13 = arith.constant 0 : index
    %c0_14 = arith.constant 0 : index
    %27 = vector.load %arg5[%c0_13, %c0_14] : memref<1x96xf32, #tpu.memory_space<vmem>>, vector<1x96xf32>
    %28 = vector.broadcast %27 : vector<1x96xf32> to vector<24x96xf32>
    %29 = arith.addf %26, %28 : vector<24x96xf32>
    %30 = tpu.iota {dimensions = array<i32: 1>} : vector<24x24xi32>
    %c17_i32 = arith.constant 17 : i32
    %31 = vector.broadcast %c17_i32 : i32 to vector<24x24xi32>
    %32 = arith.cmpi slt, %30, %31 : vector<24x24xi32>
    %cst_15 = arith.constant 0.000000e+00 : f32
    %33 = vector.broadcast %cst_15 : f32 to vector<24x32xf32>
    %34 = vector.extract_strided_slice %29 {offsets = [0, 0], sizes = [24, 8], strides = [1, 1]} : vector<24x96xf32> to vector<24x8xf32>
    %cst_16 = arith.constant 0.353553385 : f32
    %35 = vector.broadcast %cst_16 : f32 to vector<24x8xf32>
    %36 = arith.mulf %34, %35 : vector<24x8xf32>
    %37 = arith.truncf %36 : vector<24x8xf32> to vector<24x8xbf16>
    %38 = vector.extract_strided_slice %29 {offsets = [0, 32], sizes = [24, 8], strides = [1, 1]} : vector<24x96xf32> to vector<24x8xf32>
    %39 = arith.truncf %38 : vector<24x8xf32> to vector<24x8xbf16>
    %40 = vector.extract_strided_slice %29 {offsets = [0, 64], sizes = [24, 8], strides = [1, 1]} : vector<24x96xf32> to vector<24x8xf32>
    %41 = arith.truncf %40 : vector<24x8xf32> to vector<24x8xbf16>
    %42 = tpu.transpose %39, [1, 0] : vector<24x8xbf16> -> vector<8x24xbf16>
    %cst_17 = arith.constant dense<0.000000e+00> : vector<24x24xf32>
    %43 = tpu.matmul %37, %42, %cst_17 {dimension_numbers = #tpu.dot_dimension_numbers<[1], [0], [0], [1], [0, 0, 1, 1], [], []>} : vector<24x8xbf16>, vector<8x24xbf16>, vector<24x24xf32> -> vector<24x24xf32>
    %cst_18 = arith.constant -1.000000e+30 : f32
    %44 = vector.broadcast %cst_18 : f32 to vector<24x24xf32>
    %45 = arith.select %32, %43, %44 : vector<24x24xi1>, vector<24x24xf32>
    %cst_19 = arith.constant dense<0xFF800000> : vector<24xf32>
    %46 = vector.multi_reduction <maximumf>, %45, %cst_19 [1] : vector<24x24xf32> to vector<24xf32>
    %47 = vector.shape_cast %46 : vector<24xf32> to vector<24x1xf32>
    %48 = vector.broadcast %47 : vector<24x1xf32> to vector<24x24xf32>
    %49 = arith.subf %45, %48 : vector<24x24xf32>
    %50 = math.exp %49 : vector<24x24xf32>
    %cst_20 = arith.constant dense<0.000000e+00> : vector<24xf32>
    %51 = vector.multi_reduction <add>, %50, %cst_20 [1] : vector<24x24xf32> to vector<24xf32>
    %52 = vector.shape_cast %51 : vector<24xf32> to vector<24x1xf32>
    %53 = tpu.reciprocal %52 {approx = true} : vector<24x1xf32> -> vector<24x1xf32>
    %54 = vector.broadcast %53 : vector<24x1xf32> to vector<24x24xf32>
    %55 = arith.mulf %50, %54 : vector<24x24xf32>
    %56 = arith.truncf %55 : vector<24x24xf32> to vector<24x24xbf16>
    %cst_21 = arith.constant dense<0.000000e+00> : vector<24x8xf32>
    %57 = tpu.matmul %56, %41, %cst_21 {dimension_numbers = #tpu.dot_dimension_numbers<[1], [0], [0], [1], [0, 0, 1, 1], [], []>} : vector<24x24xbf16>, vector<24x8xbf16>, vector<24x8xf32> -> vector<24x8xf32>
    %c0_22 = arith.constant 0 : index
    %c0_23 = arith.constant 0 : index
    %58 = vector.load %arg6[%c0_22, %c0_23] : memref<32x32xbf16, #tpu.memory_space<vmem>>, vector<8x32xbf16>
    %59 = arith.truncf %57 : vector<24x8xf32> to vector<24x8xbf16>
    %cst_24 = arith.constant dense<0.000000e+00> : vector<24x32xf32>
    %60 = tpu.matmul %59, %58, %cst_24 {dimension_numbers = #tpu.dot_dimension_numbers<[1], [0], [0], [1], [0, 0, 1, 1], [], []>} : vector<24x8xbf16>, vector<8x32xbf16>, vector<24x32xf32> -> vector<24x32xf32>
    %61 = arith.addf %33, %60 : vector<24x32xf32>
    %62 = vector.extract_strided_slice %29 {offsets = [0, 8], sizes = [24, 8], strides = [1, 1]} : vector<24x96xf32> to vector<24x8xf32>
    %cst_25 = arith.constant 0.353553385 : f32
    %63 = vector.broadcast %cst_25 : f32 to vector<24x8xf32>
    %64 = arith.mulf %62, %63 : vector<24x8xf32>
    %65 = arith.truncf %64 : vector<24x8xf32> to vector<24x8xbf16>
    %66 = vector.extract_strided_slice %29 {offsets = [0, 40], sizes = [24, 8], strides = [1, 1]} : vector<24x96xf32> to vector<24x8xf32>
    %67 = arith.truncf %66 : vector<24x8xf32> to vector<24x8xbf16>
    %68 = vector.extract_strided_slice %29 {offsets = [0, 72], sizes = [24, 8], strides = [1, 1]} : vector<24x96xf32> to vector<24x8xf32>
    %69 = arith.truncf %68 : vector<24x8xf32> to vector<24x8xbf16>
    %70 = tpu.transpose %67, [1, 0] : vector<24x8xbf16> -> vector<8x24xbf16>
    %cst_26 = arith.constant dense<0.000000e+00> : vector<24x24xf32>
    %71 = tpu.matmul %65, %70, %cst_26 {dimension_numbers = #tpu.dot_dimension_numbers<[1], [0], [0], [1], [0, 0, 1, 1], [], []>} : vector<24x8xbf16>, vector<8x24xbf16>, vector<24x24xf32> -> vector<24x24xf32>
    %cst_27 = arith.constant -1.000000e+30 : f32
    %72 = vector.broadcast %cst_27 : f32 to vector<24x24xf32>
    %73 = arith.select %32, %71, %72 : vector<24x24xi1>, vector<24x24xf32>
    %cst_28 = arith.constant dense<0xFF800000> : vector<24xf32>
    %74 = vector.multi_reduction <maximumf>, %73, %cst_28 [1] : vector<24x24xf32> to vector<24xf32>
    %75 = vector.shape_cast %74 : vector<24xf32> to vector<24x1xf32>
    %76 = vector.broadcast %75 : vector<24x1xf32> to vector<24x24xf32>
    %77 = arith.subf %73, %76 : vector<24x24xf32>
    %78 = math.exp %77 : vector<24x24xf32>
    %cst_29 = arith.constant dense<0.000000e+00> : vector<24xf32>
    %79 = vector.multi_reduction <add>, %78, %cst_29 [1] : vector<24x24xf32> to vector<24xf32>
    %80 = vector.shape_cast %79 : vector<24xf32> to vector<24x1xf32>
    %81 = tpu.reciprocal %80 {approx = true} : vector<24x1xf32> -> vector<24x1xf32>
    %82 = vector.broadcast %81 : vector<24x1xf32> to vector<24x24xf32>
    %83 = arith.mulf %78, %82 : vector<24x24xf32>
    %84 = arith.truncf %83 : vector<24x24xf32> to vector<24x24xbf16>
    %cst_30 = arith.constant dense<0.000000e+00> : vector<24x8xf32>
    %85 = tpu.matmul %84, %69, %cst_30 {dimension_numbers = #tpu.dot_dimension_numbers<[1], [0], [0], [1], [0, 0, 1, 1], [], []>} : vector<24x24xbf16>, vector<24x8xbf16>, vector<24x8xf32> -> vector<24x8xf32>
    %c8 = arith.constant 8 : index
    %c0_31 = arith.constant 0 : index
    %86 = vector.load %arg6[%c8, %c0_31] : memref<32x32xbf16, #tpu.memory_space<vmem>>, vector<8x32xbf16>
    %87 = arith.truncf %85 : vector<24x8xf32> to vector<24x8xbf16>
    %cst_32 = arith.constant dense<0.000000e+00> : vector<24x32xf32>
    %88 = tpu.matmul %87, %86, %cst_32 {dimension_numbers = #tpu.dot_dimension_numbers<[1], [0], [0], [1], [0, 0, 1, 1], [], []>} : vector<24x8xbf16>, vector<8x32xbf16>, vector<24x32xf32> -> vector<24x32xf32>
    %89 = arith.addf %61, %88 : vector<24x32xf32>
    %90 = vector.extract_strided_slice %29 {offsets = [0, 16], sizes = [24, 8], strides = [1, 1]} : vector<24x96xf32> to vector<24x8xf32>
    %cst_33 = arith.constant 0.353553385 : f32
    %91 = vector.broadcast %cst_33 : f32 to vector<24x8xf32>
    %92 = arith.mulf %90, %91 : vector<24x8xf32>
    %93 = arith.truncf %92 : vector<24x8xf32> to vector<24x8xbf16>
    %94 = vector.extract_strided_slice %29 {offsets = [0, 48], sizes = [24, 8], strides = [1, 1]} : vector<24x96xf32> to vector<24x8xf32>
    %95 = arith.truncf %94 : vector<24x8xf32> to vector<24x8xbf16>
    %96 = vector.extract_strided_slice %29 {offsets = [0, 80], sizes = [24, 8], strides = [1, 1]} : vector<24x96xf32> to vector<24x8xf32>
    %97 = arith.truncf %96 : vector<24x8xf32> to vector<24x8xbf16>
    %98 = tpu.transpose %95, [1, 0] : vector<24x8xbf16> -> vector<8x24xbf16>
    %cst_34 = arith.constant dense<0.000000e+00> : vector<24x24xf32>
    %99 = tpu.matmul %93, %98, %cst_34 {dimension_numbers = #tpu.dot_dimension_numbers<[1], [0], [0], [1], [0, 0, 1, 1], [], []>} : vector<24x8xbf16>, vector<8x24xbf16>, vector<24x24xf32> -> vector<24x24xf32>
    %cst_35 = arith.constant -1.000000e+30 : f32
    %100 = vector.broadcast %cst_35 : f32 to vector<24x24xf32>
    %101 = arith.select %32, %99, %100 : vector<24x24xi1>, vector<24x24xf32>
    %cst_36 = arith.constant dense<0xFF800000> : vector<24xf32>
    %102 = vector.multi_reduction <maximumf>, %101, %cst_36 [1] : vector<24x24xf32> to vector<24xf32>
    %103 = vector.shape_cast %102 : vector<24xf32> to vector<24x1xf32>
    %104 = vector.broadcast %103 : vector<24x1xf32> to vector<24x24xf32>
    %105 = arith.subf %101, %104 : vector<24x24xf32>
    %106 = math.exp %105 : vector<24x24xf32>
    %cst_37 = arith.constant dense<0.000000e+00> : vector<24xf32>
    %107 = vector.multi_reduction <add>, %106, %cst_37 [1] : vector<24x24xf32> to vector<24xf32>
    %108 = vector.shape_cast %107 : vector<24xf32> to vector<24x1xf32>
    %109 = tpu.reciprocal %108 {approx = true} : vector<24x1xf32> -> vector<24x1xf32>
    %110 = vector.broadcast %109 : vector<24x1xf32> to vector<24x24xf32>
    %111 = arith.mulf %106, %110 : vector<24x24xf32>
    %112 = arith.truncf %111 : vector<24x24xf32> to vector<24x24xbf16>
    %cst_38 = arith.constant dense<0.000000e+00> : vector<24x8xf32>
    %113 = tpu.matmul %112, %97, %cst_38 {dimension_numbers = #tpu.dot_dimension_numbers<[1], [0], [0], [1], [0, 0, 1, 1], [], []>} : vector<24x24xbf16>, vector<24x8xbf16>, vector<24x8xf32> -> vector<24x8xf32>
    %c16 = arith.constant 16 : index
    %c0_39 = arith.constant 0 : index
    %114 = vector.load %arg6[%c16, %c0_39] : memref<32x32xbf16, #tpu.memory_space<vmem>>, vector<8x32xbf16>
    %115 = arith.truncf %113 : vector<24x8xf32> to vector<24x8xbf16>
    %cst_40 = arith.constant dense<0.000000e+00> : vector<24x32xf32>
    %116 = tpu.matmul %115, %114, %cst_40 {dimension_numbers = #tpu.dot_dimension_numbers<[1], [0], [0], [1], [0, 0, 1, 1], [], []>} : vector<24x8xbf16>, vector<8x32xbf16>, vector<24x32xf32> -> vector<24x32xf32>
    %117 = arith.addf %89, %116 : vector<24x32xf32>
    %118 = vector.extract_strided_slice %29 {offsets = [0, 24], sizes = [24, 8], strides = [1, 1]} : vector<24x96xf32> to vector<24x8xf32>
    %cst_41 = arith.constant 0.353553385 : f32
    %119 = vector.broadcast %cst_41 : f32 to vector<24x8xf32>
    %120 = arith.mulf %118, %119 : vector<24x8xf32>
    %121 = arith.truncf %120 : vector<24x8xf32> to vector<24x8xbf16>
    %122 = vector.extract_strided_slice %29 {offsets = [0, 56], sizes = [24, 8], strides = [1, 1]} : vector<24x96xf32> to vector<24x8xf32>
    %123 = arith.truncf %122 : vector<24x8xf32> to vector<24x8xbf16>
    %124 = vector.extract_strided_slice %29 {offsets = [0, 88], sizes = [24, 8], strides = [1, 1]} : vector<24x96xf32> to vector<24x8xf32>
    %125 = arith.truncf %124 : vector<24x8xf32> to vector<24x8xbf16>
    %126 = tpu.transpose %123, [1, 0] : vector<24x8xbf16> -> vector<8x24xbf16>
    %cst_42 = arith.constant dense<0.000000e+00> : vector<24x24xf32>
    %127 = tpu.matmul %121, %126, %cst_42 {dimension_numbers = #tpu.dot_dimension_numbers<[1], [0], [0], [1], [0, 0, 1, 1], [], []>} : vector<24x8xbf16>, vector<8x24xbf16>, vector<24x24xf32> -> vector<24x24xf32>
    %cst_43 = arith.constant -1.000000e+30 : f32
    %128 = vector.broadcast %cst_43 : f32 to vector<24x24xf32>
    %129 = arith.select %32, %127, %128 : vector<24x24xi1>, vector<24x24xf32>
    %cst_44 = arith.constant dense<0xFF800000> : vector<24xf32>
    %130 = vector.multi_reduction <maximumf>, %129, %cst_44 [1] : vector<24x24xf32> to vector<24xf32>
    %131 = vector.shape_cast %130 : vector<24xf32> to vector<24x1xf32>
    %132 = vector.broadcast %131 : vector<24x1xf32> to vector<24x24xf32>
    %133 = arith.subf %129, %132 : vector<24x24xf32>
    %134 = math.exp %133 : vector<24x24xf32>
    %cst_45 = arith.constant dense<0.000000e+00> : vector<24xf32>
    %135 = vector.multi_reduction <add>, %134, %cst_45 [1] : vector<24x24xf32> to vector<24xf32>
    %136 = vector.shape_cast %135 : vector<24xf32> to vector<24x1xf32>
    %137 = tpu.reciprocal %136 {approx = true} : vector<24x1xf32> -> vector<24x1xf32>
    %138 = vector.broadcast %137 : vector<24x1xf32> to vector<24x24xf32>
    %139 = arith.mulf %134, %138 : vector<24x24xf32>
    %140 = arith.truncf %139 : vector<24x24xf32> to vector<24x24xbf16>
    %cst_46 = arith.constant dense<0.000000e+00> : vector<24x8xf32>
    %141 = tpu.matmul %140, %125, %cst_46 {dimension_numbers = #tpu.dot_dimension_numbers<[1], [0], [0], [1], [0, 0, 1, 1], [], []>} : vector<24x24xbf16>, vector<24x8xbf16>, vector<24x8xf32> -> vector<24x8xf32>
    %c24 = arith.constant 24 : index
    %c0_47 = arith.constant 0 : index
    %142 = vector.load %arg6[%c24, %c0_47] : memref<32x32xbf16, #tpu.memory_space<vmem>>, vector<8x32xbf16>
    %143 = arith.truncf %141 : vector<24x8xf32> to vector<24x8xbf16>
    %cst_48 = arith.constant dense<0.000000e+00> : vector<24x32xf32>
    %144 = tpu.matmul %143, %142, %cst_48 {dimension_numbers = #tpu.dot_dimension_numbers<[1], [0], [0], [1], [0, 0, 1, 1], [], []>} : vector<24x8xbf16>, vector<8x32xbf16>, vector<24x32xf32> -> vector<24x32xf32>
    %145 = arith.addf %117, %144 : vector<24x32xf32>
    %146 = arith.addf %1, %145 : vector<24x32xf32>
    %c0_49 = arith.constant 0 : index
    %c0_50 = arith.constant 0 : index
    %147 = vector.load %arg7[%c0_49, %c0_50] : memref<1x32xf32, #tpu.memory_space<vmem>>, vector<1x32xf32>
    %148 = vector.broadcast %147 : vector<1x32xf32> to vector<24x32xf32>
    %149 = arith.addf %146, %148 : vector<24x32xf32>
    %c0_51 = arith.constant 0 : index
    %c0_52 = arith.constant 0 : index
    %150 = vector.load %arg8[%c0_51, %c0_52] : memref<1x32xf32, #tpu.memory_space<vmem>>, vector<1x32xf32>
    %c0_53 = arith.constant 0 : index
    %c0_54 = arith.constant 0 : index
    %151 = vector.load %arg9[%c0_53, %c0_54] : memref<1x32xf32, #tpu.memory_space<vmem>>, vector<1x32xf32>
    %cst_55 = arith.constant dense<0.000000e+00> : vector<24xf32>
    %152 = vector.multi_reduction <add>, %149, %cst_55 [1] : vector<24x32xf32> to vector<24xf32>
    %153 = vector.shape_cast %152 : vector<24xf32> to vector<24x1xf32>
    %cst_56 = arith.constant 3.200000e+01 : f32
    %154 = vector.broadcast %cst_56 : f32 to vector<24x1xf32>
    %155 = arith.divf %153, %154 : vector<24x1xf32>
    %156 = vector.broadcast %155 : vector<24x1xf32> to vector<24x32xf32>
    %157 = arith.subf %149, %156 : vector<24x32xf32>
    %158 = arith.mulf %157, %157 : vector<24x32xf32>
    %cst_57 = arith.constant dense<0.000000e+00> : vector<24xf32>
    %159 = vector.multi_reduction <add>, %158, %cst_57 [1] : vector<24x32xf32> to vector<24xf32>
    %160 = vector.shape_cast %159 : vector<24xf32> to vector<24x1xf32>
    %cst_58 = arith.constant 3.200000e+01 : f32
    %161 = vector.broadcast %cst_58 : f32 to vector<24x1xf32>
    %162 = arith.divf %160, %161 : vector<24x1xf32>
    %cst_59 = arith.constant 9.99999974E-6 : f32
    %163 = vector.broadcast %cst_59 : f32 to vector<24x1xf32>
    %164 = arith.addf %162, %163 : vector<24x1xf32>
    %165 = math.rsqrt %164 : vector<24x1xf32>
    %166 = vector.broadcast %165 : vector<24x1xf32> to vector<24x32xf32>
    %167 = arith.mulf %157, %166 : vector<24x32xf32>
    %168 = vector.broadcast %150 : vector<1x32xf32> to vector<24x32xf32>
    %169 = arith.mulf %167, %168 : vector<24x32xf32>
    %170 = vector.broadcast %151 : vector<1x32xf32> to vector<24x32xf32>
    %171 = arith.addf %169, %170 : vector<24x32xf32>
    %172 = arith.truncf %171 : vector<24x32xf32> to vector<24x32xbf16>
    %c0_60 = arith.constant 0 : index
    %c0_61 = arith.constant 0 : index
    %173 = vector.load %arg10[%c0_60, %c0_61] : memref<32x128xbf16, #tpu.memory_space<vmem>>, vector<32x128xbf16>
    %cst_62 = arith.constant dense<0.000000e+00> : vector<24x128xf32>
    %174 = tpu.matmul %172, %173, %cst_62 {dimension_numbers = #tpu.dot_dimension_numbers<[1], [0], [0], [1], [0, 0, 1, 1], [], []>} : vector<24x32xbf16>, vector<32x128xbf16>, vector<24x128xf32> -> vector<24x128xf32>
    %c0_63 = arith.constant 0 : index
    %c0_64 = arith.constant 0 : index
    %175 = vector.load %arg11[%c0_63, %c0_64] : memref<1x128xf32, #tpu.memory_space<vmem>>, vector<1x128xf32>
    %176 = vector.broadcast %175 : vector<1x128xf32> to vector<24x128xf32>
    %177 = arith.addf %174, %176 : vector<24x128xf32>
    %cst_65 = arith.constant 1.702000e+00 : f32
    %178 = vector.broadcast %cst_65 : f32 to vector<24x128xf32>
    %179 = arith.mulf %178, %177 : vector<24x128xf32>
    %180 = arith.negf %179 : vector<24x128xf32>
    %181 = math.exp %180 : vector<24x128xf32>
    %cst_66 = arith.constant 1.000000e+00 : f32
    %182 = vector.broadcast %cst_66 : f32 to vector<24x128xf32>
    %183 = arith.addf %182, %181 : vector<24x128xf32>
    %184 = arith.divf %182, %183 : vector<24x128xf32>
    %185 = arith.mulf %177, %184 : vector<24x128xf32>
    %186 = arith.truncf %185 : vector<24x128xf32> to vector<24x128xbf16>
    %c0_67 = arith.constant 0 : index
    %c0_68 = arith.constant 0 : index
    %187 = vector.load %arg12[%c0_67, %c0_68] : memref<128x32xbf16, #tpu.memory_space<vmem>>, vector<128x32xbf16>
    %cst_69 = arith.constant dense<0.000000e+00> : vector<24x32xf32>
    %188 = tpu.matmul %186, %187, %cst_69 {dimension_numbers = #tpu.dot_dimension_numbers<[1], [0], [0], [1], [0, 0, 1, 1], [], []>} : vector<24x128xbf16>, vector<128x32xbf16>, vector<24x32xf32> -> vector<24x32xf32>
    %189 = arith.addf %149, %188 : vector<24x32xf32>
    %c0_70 = arith.constant 0 : index
    %c0_71 = arith.constant 0 : index
    %190 = vector.load %arg13[%c0_70, %c0_71] : memref<1x32xf32, #tpu.memory_space<vmem>>, vector<1x32xf32>
    %191 = vector.broadcast %190 : vector<1x32xf32> to vector<24x32xf32>
    %192 = arith.addf %189, %191 : vector<24x32xf32>
    %c0_72 = arith.constant 0 : index
    %c0_73 = arith.constant 0 : index
    %c0_74 = arith.constant 0 : index
    %193 = vector.load %arg14[%c0_72, %c0_73, %c0_74] : memref<1x24x32xf32, #tpu.memory_space<vmem>>, vector<1x24x32xf32>
    %194 = vector.shape_cast %193 : vector<1x24x32xf32> to vector<24x32xf32>
    %195 = vector.shape_cast %192 : vector<24x32xf32> to vector<1x24x32xf32>
    tpu.vector_store %arg14[%c0_72, %c0_73, %c0_74], %195 {strides = array<i32>} : memref<1x24x32xf32, #tpu.memory_space<vmem>>, vector<1x24x32xf32>,
    return
  }
  func.func @transform_0(%arg0: i32) -> (i32, i32, i32) {
    %c0_i32 = arith.constant 0 : i32
    %c0_i32_0 = arith.constant 0 : i32
    %c0_i32_1 = arith.constant 0 : i32
    return %arg0, %c0_i32, %c0_i32_0 : i32, i32, i32
  }
  func.func @transform_1(%arg0: i32) -> (i32, i32) {
    %c0_i32 = arith.constant 0 : i32
    %c0_i32_0 = arith.constant 0 : i32
    %c0_i32_1 = arith.constant 0 : i32
    return %c0_i32, %c0_i32_0 : i32, i32
  }
  func.func @transform_2(%arg0: i32) -> (i32, i32) {
    %c0_i32 = arith.constant 0 : i32
    %c0_i32_0 = arith.constant 0 : i32
    %c0_i32_1 = arith.constant 0 : i32
    return %c0_i32, %c0_i32_0 : i32, i32
  }
  func.func @transform_3(%arg0: i32) -> (i32, i32) {
    %c0_i32 = arith.constant 0 : i32
    %c0_i32_0 = arith.constant 0 : i32
    %c0_i32_1 = arith.constant 0 : i32
    return %c0_i32, %c0_i32_0 : i32, i32
  }
  func.func @transform_4(%arg0: i32) -> (i32, i32) {
    %c0_i32 = arith.constant 0 : i32
    %c0_i32_0 = arith.constant 0 : i32
    %c0_i32_1 = arith.constant 0 : i32
    return %c0_i32, %c0_i32_0 : i32, i32
  }
  func.func @transform_5(%arg0: i32) -> (i32, i32) {
    %c0_i32 = arith.constant 0 : i32
    %c0_i32_0 = arith.constant 0 : i32
    %c0_i32_1 = arith.constant 0 : i32
    return %c0_i32, %c0_i32_0 : i32, i32
  }
  func.func @transform_6(%arg0: i32) -> (i32, i32) {
    %c0_i32 = arith.constant 0 : i32
    %c0_i32_0 = arith.constant 0 : i32
    %c0_i32_1 = arith.constant 0 : i32
    return %c0_i32, %c0_i32_0 : i32, i32
  }
  func.func @transform_7(%arg0: i32) -> (i32, i32) {
    %c0_i32 = arith.constant 0 : i32
    %c0_i32_0 = arith.constant 0 : i32
    %c0_i32_1 = arith.constant 0 : i32
    return %c0_i32, %c0_i32_0 : i32, i32
  }
  func.func @transform_8(%arg0: i32) -> (i32, i32) {
    %c0_i32 = arith.constant 0 : i32
    %c0_i32_0 = arith.constant 0 : i32
    %c0_i32_1 = arith.constant 0 : i32
    return %c0_i32, %c0_i32_0 : i32, i32
  }
  func.func @transform_9(%arg0: i32) -> (i32, i32) {
    %c0_i32 = arith.constant 0 : i32
    %c0_i32_0 = arith.constant 0 : i32
    %c0_i32_1 = arith.constant 0 : i32
    return %c0_i32, %c0_i32_0 : i32, i32
  }
  func.func @transform_10(%arg0: i32) -> (i32, i32) {
    %c0_i32 = arith.constant 0 : i32
    %c0_i32_0 = arith.constant 0 : i32
    %c0_i32_1 = arith.constant 0 : i32
    return %c0_i32, %c0_i32_0 : i32, i32
  }
  func.func @transform_11(%arg0: i32) -> (i32, i32) {
    %c0_i32 = arith.constant 0 : i32
    %c0_i32_0 = arith.constant 0 : i32
    %c0_i32_1 = arith.constant 0 : i32
    return %c0_i32, %c0_i32_0 : i32, i32
  }
  func.func @transform_12(%arg0: i32) -> (i32, i32) {
    %c0_i32 = arith.constant 0 : i32
    %c0_i32_0 = arith.constant 0 : i32
    %c0_i32_1 = arith.constant 0 : i32
    return %c0_i32, %c0_i32_0 : i32, i32
  }
  func.func @transform_13(%arg0: i32) -> (i32, i32, i32) {
    %c0_i32 = arith.constant 0 : i32
    %c0_i32_0 = arith.constant 0 : i32
    %c0_i32_1 = arith.constant 0 : i32
    return %arg0, %c0_i32, %c0_i32_0 : i32, i32, i32
  }
}

module attributes {stable_mosaic.version = 11 : i64} {
  func.func @_head_kernel(%arg0: i32, %arg1: memref<2x32xf32, #tpu.memory_space<vmem>>, %arg2: memref<1x32xf32, #tpu.memory_space<vmem>>, %arg3: memref<1x32xf32, #tpu.memory_space<vmem>>, %arg4: memref<32x16xbf16, #tpu.memory_space<vmem>>, %arg5: memref<16x8xbf16, #tpu.memory_space<vmem>>, %arg6: memref<1x8xf32, #tpu.memory_space<vmem>>, %arg7: memref<2x8xf32, #tpu.memory_space<vmem>>) attributes {dimension_semantics = [#tpu.dimension_semantics<arbitrary>], iteration_bounds = array<i64: 1>, scalar_prefetch = 0 : i64, scratch_operands = 0 : i64, tpu.core_type = #tpu.core_type<tc>, window_params = [{pipeline_mode = #tpu.pipeline_mode<synchronous>, transform_indices = @transform_0, window_bounds = array<i64: 2, 32>}, {pipeline_mode = #tpu.pipeline_mode<synchronous>, transform_indices = @transform_1, window_bounds = array<i64: 1, 32>}, {pipeline_mode = #tpu.pipeline_mode<synchronous>, transform_indices = @transform_2, window_bounds = array<i64: 1, 32>}, {pipeline_mode = #tpu.pipeline_mode<synchronous>, transform_indices = @transform_3, window_bounds = array<i64: 32, 16>}, {pipeline_mode = #tpu.pipeline_mode<synchronous>, transform_indices = @transform_4, window_bounds = array<i64: 16, 8>}, {pipeline_mode = #tpu.pipeline_mode<synchronous>, transform_indices = @transform_5, window_bounds = array<i64: 1, 8>}, {pipeline_mode = #tpu.pipeline_mode<synchronous>, transform_indices = @transform_6, window_bounds = array<i64: 2, 8>}]} {
    %c0 = arith.constant 0 : index
    %c0_0 = arith.constant 0 : index
    %0 = vector.load %arg1[%c0, %c0_0] : memref<2x32xf32, #tpu.memory_space<vmem>>, vector<2x32xf32>
    %c0_1 = arith.constant 0 : index
    %c0_2 = arith.constant 0 : index
    %1 = vector.load %arg2[%c0_1, %c0_2] : memref<1x32xf32, #tpu.memory_space<vmem>>, vector<1x32xf32>
    %c0_3 = arith.constant 0 : index
    %c0_4 = arith.constant 0 : index
    %2 = vector.load %arg3[%c0_3, %c0_4] : memref<1x32xf32, #tpu.memory_space<vmem>>, vector<1x32xf32>
    %cst = arith.constant dense<0.000000e+00> : vector<2xf32>
    %3 = vector.multi_reduction <add>, %0, %cst [1] : vector<2x32xf32> to vector<2xf32>
    %4 = vector.shape_cast %3 : vector<2xf32> to vector<2x1xf32>
    %cst_5 = arith.constant 3.200000e+01 : f32
    %5 = vector.broadcast %cst_5 : f32 to vector<2x1xf32>
    %6 = arith.divf %4, %5 : vector<2x1xf32>
    %7 = vector.broadcast %6 : vector<2x1xf32> to vector<2x32xf32>
    %8 = arith.subf %0, %7 : vector<2x32xf32>
    %9 = arith.mulf %8, %8 : vector<2x32xf32>
    %cst_6 = arith.constant dense<0.000000e+00> : vector<2xf32>
    %10 = vector.multi_reduction <add>, %9, %cst_6 [1] : vector<2x32xf32> to vector<2xf32>
    %11 = vector.shape_cast %10 : vector<2xf32> to vector<2x1xf32>
    %cst_7 = arith.constant 3.200000e+01 : f32
    %12 = vector.broadcast %cst_7 : f32 to vector<2x1xf32>
    %13 = arith.divf %11, %12 : vector<2x1xf32>
    %cst_8 = arith.constant 9.99999974E-6 : f32
    %14 = vector.broadcast %cst_8 : f32 to vector<2x1xf32>
    %15 = arith.addf %13, %14 : vector<2x1xf32>
    %16 = math.rsqrt %15 : vector<2x1xf32>
    %17 = vector.broadcast %16 : vector<2x1xf32> to vector<2x32xf32>
    %18 = arith.mulf %8, %17 : vector<2x32xf32>
    %19 = vector.broadcast %1 : vector<1x32xf32> to vector<2x32xf32>
    %20 = arith.mulf %18, %19 : vector<2x32xf32>
    %21 = vector.broadcast %2 : vector<1x32xf32> to vector<2x32xf32>
    %22 = arith.addf %20, %21 : vector<2x32xf32>
    %23 = arith.truncf %22 : vector<2x32xf32> to vector<2x32xbf16>
    %c0_9 = arith.constant 0 : index
    %c0_10 = arith.constant 0 : index
    %24 = vector.load %arg4[%c0_9, %c0_10] : memref<32x16xbf16, #tpu.memory_space<vmem>>, vector<32x16xbf16>
    %cst_11 = arith.constant dense<0.000000e+00> : vector<2x16xf32>
    %25 = tpu.matmul %23, %24, %cst_11 {dimension_numbers = #tpu.dot_dimension_numbers<[1], [0], [0], [1], [0, 0, 1, 1], [], []>} : vector<2x32xbf16>, vector<32x16xbf16>, vector<2x16xf32> -> vector<2x16xf32>
    %26 = arith.truncf %25 : vector<2x16xf32> to vector<2x16xbf16>
    %c0_12 = arith.constant 0 : index
    %c0_13 = arith.constant 0 : index
    %27 = vector.load %arg5[%c0_12, %c0_13] : memref<16x8xbf16, #tpu.memory_space<vmem>>, vector<16x8xbf16>
    %cst_14 = arith.constant dense<0.000000e+00> : vector<2x8xf32>
    %28 = tpu.matmul %26, %27, %cst_14 {dimension_numbers = #tpu.dot_dimension_numbers<[1], [0], [0], [1], [0, 0, 1, 1], [], []>} : vector<2x16xbf16>, vector<16x8xbf16>, vector<2x8xf32> -> vector<2x8xf32>
    %c0_15 = arith.constant 0 : index
    %c0_16 = arith.constant 0 : index
    %29 = vector.load %arg6[%c0_15, %c0_16] : memref<1x8xf32, #tpu.memory_space<vmem>>, vector<1x8xf32>
    %30 = vector.broadcast %29 : vector<1x8xf32> to vector<2x8xf32>
    %31 = arith.addf %28, %30 : vector<2x8xf32>
    %c0_17 = arith.constant 0 : index
    %c0_18 = arith.constant 0 : index
    %32 = vector.load %arg7[%c0_17, %c0_18] : memref<2x8xf32, #tpu.memory_space<vmem>>, vector<2x8xf32>
    tpu.vector_store %arg7[%c0_17, %c0_18], %31 {strides = array<i32>} : memref<2x8xf32, #tpu.memory_space<vmem>>, vector<2x8xf32>,
    return
  }
  func.func @transform_0(%arg0: i32) -> (i32, i32) {
    %c0_i32 = arith.constant 0 : i32
    %c0_i32_0 = arith.constant 0 : i32
    %c0_i32_1 = arith.constant 0 : i32
    return %c0_i32, %c0_i32_0 : i32, i32
  }
  func.func @transform_1(%arg0: i32) -> (i32, i32) {
    %c0_i32 = arith.constant 0 : i32
    %c0_i32_0 = arith.constant 0 : i32
    %c0_i32_1 = arith.constant 0 : i32
    return %c0_i32, %c0_i32_0 : i32, i32
  }
  func.func @transform_2(%arg0: i32) -> (i32, i32) {
    %c0_i32 = arith.constant 0 : i32
    %c0_i32_0 = arith.constant 0 : i32
    %c0_i32_1 = arith.constant 0 : i32
    return %c0_i32, %c0_i32_0 : i32, i32
  }
  func.func @transform_3(%arg0: i32) -> (i32, i32) {
    %c0_i32 = arith.constant 0 : i32
    %c0_i32_0 = arith.constant 0 : i32
    %c0_i32_1 = arith.constant 0 : i32
    return %c0_i32, %c0_i32_0 : i32, i32
  }
  func.func @transform_4(%arg0: i32) -> (i32, i32) {
    %c0_i32 = arith.constant 0 : i32
    %c0_i32_0 = arith.constant 0 : i32
    %c0_i32_1 = arith.constant 0 : i32
    return %c0_i32, %c0_i32_0 : i32, i32
  }
  func.func @transform_5(%arg0: i32) -> (i32, i32) {
    %c0_i32 = arith.constant 0 : i32
    %c0_i32_0 = arith.constant 0 : i32
    %c0_i32_1 = arith.constant 0 : i32
    return %c0_i32, %c0_i32_0 : i32, i32
  }
  func.func @transform_6(%arg0: i32) -> (i32, i32) {
    %c0_i32 = arith.constant 0 : i32
    %c0_i32_0 = arith.constant 0 : i32
    %c0_i32_1 = arith.constant 0 : i32
    return %c0_i32, %c0_i32_0 : i32, i32
  }
}

</mosaic_0001>

<bundles_post_ra>
// kernel: clip_linear_forward.4
= control target key start
LH: loop header
LB: loop body
LE: loop exit
PB: predicated region body
PF: predicated region fallthrough
CT: control target
= control target key end

     0   :  { %s642_s18 = smov 0   ;;  %s755_s0 = inlined_call_operand.vmem [shape: bf16[2,24,192], index: 0, kind: input, shape index: {}]   ;;  %s756_s1 = inlined_call_operand.vmem [shape: bf16[192,32], index: 1, kind: input, shape index: {}]   ;;  %s757_s2 = inlined_call_operand.vmem [shape: f32[24,32], index: 2, kind: input, shape index: {}]   ;;  %s758_s3 = inlined_call_operand.vmem [shape: f32[1,32], index: 3, kind: input, shape index: {}]   ;;  %s759_s4 = inlined_call_operand.vmem [shape: f32[1,32], index: 4, kind: input, shape index: {}]   ;;  %s760_s5 = inlined_call_operand.vmem [shape: f32[2,24,32], index: 5, kind: output, shape index: {}]  }
   0x1 LB: > { %s517_s19 = sadd.s32 4294967295, %s609_s18   ;;  %p521_p0 = scmp.ge.s32.totalorder %s609_s18, 1  ;;  %s609_s18 = sphi %s642_s18, %s15_s18  }
   0x2   : > { %p187_p1 = scmp.lt.s32.totalorder %s609_s18, 3 }
   0x4   : > { %p188_p2 = pnand %p521_p0, %p187_p1 }
   0x5   : > { %v580_v0 = vld [vmem:[%s756_s1] sm:$0xff] (!%p188_p2)   ;;  %v611_v1 = vmov (!%p188_p2), 0   ;;  %p215_p3 = scmp.lt.s32.totalorder (!%p188_p2), %s517_s19, 1  ;;  %v581_v2 = vld [vmem:[%s756_s1 + $0x8] sm:$0xff] (!%p188_p2)   ;;  %v582_v3 = vld [vmem:[%s756_s1 + $0x10] sm:$0xff] (!%p188_p2)   ;;  %vm343_vm0 = vcmask (!%p188_p2), 523264  }
   0x6   : > { %191 = sbr.rel (%p188_p2) target bundleno = 587 (0x24b), region = 40  ;;  %350 = vmatprep.subr.bf16.mxu0 (!%p188_p2), %v611_v1  ;;  %546 = vmatprep.subr.bf16.mxu1 (!%p188_p2), %v611_v1  ;;  %v583_v4 = vld [vmem:[%s756_s1 + $0x18] sm:$0xff] (!%p188_p2)   ;;  %v584_v7 = vld [vmem:[%s756_s1 + $0x20] sm:$0xff] (!%p188_p2)   ;;  %v585_v9 = vld [vmem:[%s756_s1 + $0x28] sm:$0xff] (!%p188_p2)   ;;  %vm400_vm1 = vcmask (!%p188_p2), 261120  }
   0x7   : > { %351 = vmatpush1.bf16.msra.mxu0 (!%p188_p2), %v580_v0  ;;  %558 = vmatpush1.bf16.msra.mxu1 (!%p188_p2), %v580_v0  ;;  %v586_v10 = vld [vmem:[%s756_s1 + $0x30] sm:$0xff] (!%p188_p2)   ;;  %v587_v11 = vld [vmem:[%s756_s1 + $0x38] sm:$0xff] (!%p188_p2)   ;;  %v588_v12 = vld [vmem:[%s756_s1 + $0x40] sm:$0xff] (!%p188_p2)  }
   0x8   : > { %352 = vmatprep.subr.bf16.mxu0 (!%p188_p2), %v611_v1  ;;  %547 = vmatprep.subr.bf16.mxu1 (!%p188_p2), %v611_v1  ;;  %v589_v13 = vld [vmem:[%s756_s1 + $0x48] sm:$0xff] (!%p188_p2)   ;;  %v590_v14 = vld [vmem:[%s756_s1 + $0x50] sm:$0xff] (!%p188_p2)   ;;  %v591_v15 = vld [vmem:[%s756_s1 + $0x58] sm:$0xff] (!%p188_p2)  }
   0x9   : > { %v253_v18 = vld [vmem:[%s757_s2] sm:$0xff] (!%p188_p2)  ;;  %v255_v19 = vld [vmem:[%s757_s2 + $0x10] sm:$0xff] (!%p188_p2)  ;;  %v254_v22 = vld [vmem:[%s757_s2 + $0x8] sm:$0xff] (!%p188_p2) }
   0xa   : > { %v542_v60 = vld [vmem:[%s758_s3] ss:$0 sm:$0xff] (!%p188_p2) }
   0xb   : > { %353 = vmatpush1.bf16.msra.mxu0 (!%p188_p2), %v581_v2  ;;  %559 = vmatpush1.bf16.msra.mxu1 (!%p188_p2), %v581_v2  ;;  %v543_v62 = vld [vmem:[%s759_s4] ss:$0 sm:$0xff] (!%p188_p2) }
   0xc   : > { %354 = vmatprep.subr.bf16.mxu0 (!%p188_p2), %v611_v1  ;;  %548 = vmatprep.subr.bf16.mxu1 (!%p188_p2), %v611_v1 }
   0xd   : > { %s762_s19 = smov (!%p215_p3, %s517_s19), 1 }
   0xe   : > { %s570_s26 = smul.u32 24, %s762_s19 }
   0xf   : > { %355 = vmatpush1.bf16.msra.mxu0 %v582_v3  ;;  %560 = vmatpush1.bf16.msra.mxu1 %v582_v3 }
  0x10   : > { %s676_s6 = scalar_lea.vmem %s755_s0, %s570_s26  ;;  %356 = vmatprep.subr.bf16.mxu0 %v611_v1  ;;  %549 = vmatprep.subr.bf16.mxu1 %v611_v1  ;;  %s224_s13 = scalar_lea.vmem %s760_s5, %s570_s26 }
  0x11   : > { %v594_v5 = vld [vmem:[%s676_s6 + $0x4] ss:$8 sps:$4 sm:$0xff]   ;;  %v228_v6 = vld [vmem:[%s676_s6 + $0x10] sm:$0xff]  ;;  %v592_v16 = vld [vmem:[%s676_s6] ss:$8 sps:$4 sm:$0xff]  }
  0x12   : > { %v527_v8 = vcombine.high %v228_v6, %v228_v6  ;;  %540 = vmatprep.mubr.msk.bf16.mxu0 %vm343_vm0, %v594_v5  ;;  %v526_v17 = vcombine.low %v228_v6, %v228_v6 }
  0x13   : > { %357 = vmatpush1.bf16.msra.mxu0 %v583_v4  ;;  %561 = vmatpush1.bf16.msra.mxu1 %v583_v4 }
  0x14   : > { %358 = vmatprep.subr.bf16.mxu0 %v611_v1  ;;  %550 = vmatprep.subr.bf16.mxu1 %v611_v1 }
  0x15   : > { %541 = vmatprep.mubr.msk.bf16.mxu1 %vm343_vm0, %v527_v8 }
  0x17   : > { %359 = vmatpush1.bf16.msra.mxu0 %v584_v7  ;;  %562 = vmatpush1.bf16.msra.mxu1 %v584_v7 }
  0x18   : > { %360 = vmatprep.subr.bf16.mxu0 %v611_v1  ;;  %551 = vmatprep.subr.bf16.mxu1 %v611_v1 }
  0x1b   : > { %361 = vmatpush1.bf16.msra.mxu0 %v585_v9  ;;  %563 = vmatpush1.bf16.msra.mxu1 %v585_v9 }
  0x1c   : > { %362 = vmatprep.subr.bf16.mxu0 %v611_v1  ;;  %552 = vmatprep.subr.bf16.mxu1 %v611_v1 }
  0x1f   : > { %363 = vmatpush1.bf16.msra.mxu0 %v586_v10  ;;  %564 = vmatpush1.bf16.msra.mxu1 %v586_v10 }
  0x20   : > { %364 = vmatprep.subr.bf16.mxu0 %v611_v1  ;;  %553 = vmatprep.subr.bf16.mxu1 %v611_v1 }
  0x23   : > { %365 = vmatpush1.bf16.msra.mxu0 %v587_v11  ;;  %565 = vmatpush1.bf16.msra.mxu1 %v587_v11 }
  0x24   : > { %366 = vmatprep.subr.bf16.mxu0 %v611_v1  ;;  %554 = vmatprep.subr.bf16.mxu1 %v611_v1 }
  0x27   : > { %367 = vmatpush1.bf16.msra.mxu0 %v588_v12  ;;  %566 = vmatpush1.bf16.msra.mxu1 %v588_v12 }
  0x28   : > { %368 = vmatprep.subr.bf16.mxu0 %v611_v1  ;;  %555 = vmatprep.subr.bf16.mxu1 %v611_v1 }
  0x2b   : > { %369 = vmatpush1.bf16.msra.mxu0 %v589_v13  ;;  %567 = vmatpush1.bf16.msra.mxu1 %v589_v13 }
  0x2c   : > { %370 = vmatprep.subr.bf16.mxu0 %v611_v1  ;;  %556 = vmatprep.subr.bf16.mxu1 %v611_v1 }
  0x2f   : > { %371 = vmatpush1.bf16.msra.mxu0 %v590_v14  ;;  %568 = vmatpush1.bf16.msra.mxu1 %v590_v14 }
  0x30   : > { %372 = vmatprep.subr.bf16.mxu0 %v611_v1  ;;  %557 = vmatprep.subr.bf16.mxu1 %v611_v1 }
  0x33   : > { %373 = vmatpush1.bf16.msra.mxu0 %v591_v15  ;;  %569 = vmatpush1.bf16.msra.mxu1 %v591_v15 }
  0x36   : > { %383 = vmatmul.mubr.bf16.vlgmr.msra.gmra.mrb[0].mxu0 %v592_v16  ;;  %391 = vmatmul.mubr.bf16.vlgmr.msra.gmra.mrb[0].mxu1 %v526_v17 }
 0x109   : > { %v384_v20 = vpop.f32.mrb[0].mxu0  ;;  %v392_v21 = vpop.f32.mrb[0].mxu1 }
 0x10a   : > { %v385_v23 = vadd.f32 %v384_v20, %v253_v18  ;;  %v393_v24 = vadd.f32 %v392_v21, %v255_v19  ;;  %v386_v25 = vpop.f32.mrb[1].mxu0  ;;  %v394_v26 = vpop.f32.mrb[1].mxu1 }
 0x10b   : > { %v387_v27 = vpop.f32.mrb[2].mxu0  ;;  %v395_v28 = vpop.f32.mrb[2].mxu1 }
 0x10c   : > { %v388_v29 = vadd.f32 %v387_v27, %v254_v22  ;;  %v389_v30 = vpop.f32.mrb[3].mxu0  ;;  %v396_v31 = vpop.f32.mrb[3].mxu1  ;;  %v407_v32 = vsel %vm400_vm1, %v393_v24, 0.0  ;;  %v401_v33 = vsel %vm400_vm1, %v385_v23, 0.0 }
 0x10d   : > { %408 = vadd.xlane.f32.xlu1 %v407_v32  ;;  %402 = vadd.xlane.f32.xlu0 %v401_v33 }
 0x10e   : > { %v404_v34 = vsel %vm400_vm1, %v388_v29, 0.0 }
 0x111   : > { %405 = vadd.xlane.f32.xlu0 %v404_v34 }
 0x19a   : > { %v409_v35 = vpop.xlane.xlu1 %408  ;;  %v403_v36 = vpop.xlane.xlu0 %402 }
 0x19b   : > { %v413_v37 = vmul.f32 0.03125, %v409_v35  ;;  %v411_v38 = vmul.f32 0.03125, %v403_v36 }
 0x19d   : > { %v416_v39 = vsub.f32 %v393_v24, %v413_v37  ;;  %v414_v40 = vsub.f32 %v385_v23, %v411_v38 }
 0x19e   : > { %v406_v41 = vpop.xlane.xlu0 %405 }
 0x19f   : > { %v412_v42 = vmul.f32 0.03125, %v406_v41  ;;  %v417_v43 = vmul.f32 %v414_v40, %v414_v40  ;;  %v419_v46 = vmul.f32 %v416_v39, %v416_v39 }
 0x1a1   : > { %v415_v44 = vsub.f32 %v388_v29, %v412_v42  ;;  %v420_v45 = vsel %vm400_vm1, %v417_v43, 0.0  ;;  %v426_v48 = vsel %vm400_vm1, %v419_v46, 0.0 }
 0x1a2   : > { %421 = vadd.xlane.f32.xlu1 %v420_v45 }
 0x1a3   : > { %v418_v47 = vmul.f32 %v415_v44, %v415_v44 }
 0x1a5   : > { %v423_v49 = vsel %vm400_vm1, %v418_v47, 0.0 }
 0x1a6   : > { %427 = vadd.xlane.f32.xlu1 %v426_v48  ;;  %424 = vadd.xlane.f32.xlu0 %v423_v49 }
 0x22f   : > { %v422_v50 = vpop.xlane.xlu1 %421 }
 0x230   : > { %v429_v51 = vmul.f32 0.03125, %v422_v50 }
 0x232   : > { %v432_v52 = vadd.f32 1e-05, %v429_v51 }
 0x233   : > { %v428_v53 = vpop.xlane.xlu1 %427  ;;  %v425_v54 = vpop.xlane.xlu0 %424 }
 0x234   : > { %597 = vrsqrt.f32 %v432_v52  ;;  %v431_v55 = vmul.f32 0.03125, %v428_v53  ;;  %v430_v56 = vmul.f32 0.03125, %v425_v54 }
 0x236   : > { %v434_v57 = vadd.f32 1e-05, %v431_v55  ;;  %v433_v58 = vadd.f32 1e-05, %v430_v56 }
 0x238   : > { %599 = vrsqrt.f32 %v434_v57 }
 0x239   : > { %601 = vrsqrt.f32 %v433_v58 }
 0x23e   : > { %v598_v59 = vpop.eup %597 }
 0x23f   : > { %v438_v61 = vmul.f32 %v598_v59, %v414_v40 }
 0x241   : > { %v447_v63 = vmul.f32 %v542_v60, %v438_v61 }
 0x242   : > { %v600_v0 = vpop.eup %599 }
 0x243   : > { %v602_v1 = vpop.eup %601  ;;  %v456_v2 = vadd.f32 %v543_v62, %v447_v63  ;;  %v440_v3 = vmul.f32 %v600_v0, %v416_v39 }
 0x244   : > { %v439_v4 = vmul.f32 %v602_v1, %v415_v44 }
 0x245   : > { %459 = vst.msk [vmem:[%s224_s13] sm:$0xff] %vm400_vm1, %v456_v2  ;;  %v449_v5 = vmul.f32 %v542_v60, %v440_v3 }
 0x246   : > { %v448_v6 = vmul.f32 %v542_v60, %v439_v4 }
 0x247   : > { %v458_v7 = vadd.f32 %v543_v62, %v449_v5 }
 0x248   : > { %v457_v8 = vadd.f32 %v543_v62, %v448_v6 }
 0x249   : > { %461 = vst.msk [vmem:[%s224_s13 + $0x10] sm:$0xff] %vm400_vm1, %v458_v7 }
 0x24a   : > { %460 = vst.msk [vmem:[%s224_s13 + $0x8] sm:$0xff] %vm400_vm1, %v457_v8 }
 0x24b PF: > { %s15_s18 = sadd.s32 1, %s609_s18  }
 0x24c   : > { %p12_p4 = scmp.ge.s32.totalorder %s15_s18, 4  }
 0x24e   :  { %14 = sbr.rel (!%p12_p4) target bundleno = 1 (0x1), region = 70 }

// kernel: clip_linear_forward.7
= control target key start
LH: loop header
LB: loop body
LE: loop exit
PB: predicated region body
PF: predicated region fallthrough
CT: control target
= control target key end

     0   :  { %vm28_vm0 = vcmask 254976   ;;  %s324_s0 = inlined_call_operand.vmem [shape: f32[2,32], index: 0, kind: input, shape index: {}]   ;;  %s325_s1 = inlined_call_operand.vmem [shape: f32[1,32], index: 1, kind: input, shape index: {}]   ;;  %s326_s2 = inlined_call_operand.vmem [shape: f32[1,32], index: 2, kind: input, shape index: {}]   ;;  %s327_s3 = inlined_call_operand.vmem [shape: bf16[32,16], index: 3, kind: input, shape index: {}]   ;;  %s328_s4 = inlined_call_operand.vmem [shape: bf16[16,8], index: 4, kind: input, shape index: {}]   ;;  %s329_s5 = inlined_call_operand.vmem [shape: f32[1,8], index: 5, kind: input, shape index: {}]   ;;  %s330_s6 = inlined_call_operand.hbm [shape: f32[2,8], index: 6, kind: output, shape index: {}]  }
   0x1   :  { %v25_v0 = vld [vmem:[%s324_s0] sm:$0x3] }
   0x2   :  { %v29_v1 = vsel %vm28_vm0, %v25_v0, 0.0 }
   0x3   :  { %30 = vadd.xlane.f32.xlu0 %v29_v1 }
   0x4   :  { %11 = vsyncpa [#allocation3], 0  ;;  %v224_v7 = vld [vmem:[%s327_s3] sm:$0xff]   ;;  %v253_v8 = vmov 0.0   ;;  %v225_v9 = vld [vmem:[%s327_s3 + $0x8] sm:$0xff]   ;;  %vm254_vm1 = vmmov 0  }
   0x5   :  { %207 = vmatprep.subr.bf16.mxu0 %v253_v8  ;;  %215 = vmatprep.subr.bf16.mxu1 %v253_v8  ;;  %v194_v14 = vld [vmem:[%s325_s1] ss:$0 sm:$0xff]  ;;  %vm74_vm2 = vcmask 261120   ;;  %vm134_vm3 = vcmask 130048   ;;  %vm178_vm4 = vcmask 58368  }
   0x6   :  { %208 = vmatpush3.bf16.msra.mxu0 %v224_v7  ;;  %211 = vmatprep.mubr.msk.bf16.mxu0 %vm254_vm1, %v253_v8  ;;  %v195_v16 = vld [vmem:[%s326_s2] ss:$0 sm:$0xff]  ;;  %s255_s2 = smov [#allocation2]  }
   0x7   :  { %209 = vmatprep.subr.bf16.mxu0 %v253_v8  ;;  %217 = vmatprep.mubr.msk.bf16.mxu1 %vm254_vm1, %v253_v8  ;;  %v226_v20 = vld [vmem:[%s328_s4] sm:$0xff]   ;;  %s186_s8 = sshll.u32 %s255_s2, 4  ;;  %s187_s8 = int_to_ptr.vmem [resolvable:$true] %s186_s8 }
   0x8   :  { %216 = vmatpush3.bf16.msra.mxu1 %v226_v20  ;;  %v199_v26 = vld [vmem:[%s329_s5] ss:$0 sm:$0xff]  ;;  %s229_s4 = scalar_lea.vmem %s187_s8, 32  ;;  %p234_p1 = scmp.lt.s32.totalorder %s187_s8, %s187_s8 }
   0x9   :  { %p230_p0 = scmp.ne.s32.totalorder %s187_s8, %s229_s4  ;;  %p235_p2 = scmp.lt.s32.totalorder %s229_s4, %s229_s4 }
   0xa   :  { %210 = vmatpush3.bf16.msra.mxu0 %v225_v9 }
   0xb   :  { %p236_p3 = por %p235_p2, %p234_p1 }
   0xd   :  { %p237_p4 = pnand %p236_p3, %p230_p0 }
  0x90   :  { %v31_v2 = vpop.xlane.xlu0 %30 }
  0x91   :  { %v33_v3 = vmul.f32 0.03125, %v31_v2 }
  0x93   :  { %v34_v4 = vsub.f32 %v25_v0, %v33_v3 }
  0x95   :  { %v35_v5 = vmul.f32 %v34_v4, %v34_v4 }
  0x97   :  { %v36_v6 = vsel %vm28_vm0, %v35_v5, 0.0 }
  0x98   :  { %37 = vadd.xlane.f32.xlu0 %v36_v6 }
 0x125   :  { %v38_v10 = vpop.xlane.xlu0 %37 }
 0x126   :  { %v39_v11 = vmul.f32 0.03125, %v38_v10 }
 0x128   :  { %v40_v12 = vadd.f32 1e-05, %v39_v11 }
 0x12a   :  { %227 = vrsqrt.f32 %v40_v12 }
 0x134   :  { %v228_v13 = vpop.eup %227 }
 0x135   :  { %v42_v15 = vmul.f32 %v228_v13, %v34_v4 }
 0x137   :  { %v49_v17 = vmul.f32 %v194_v14, %v42_v15 }
 0x139   :  { %v56_v18 = vadd.f32 %v195_v16, %v49_v17 }
 0x13b   :  { %v57_v19 = vpack.c.bf16 %v56_v18, %v56_v18 }
 0x13d   :  { %212 = vmatmul.mubr.msk.bf16.vlgmr.msra.gmra.mrb[0].mxu0 %vm74_vm2, %v57_v19 }
 0x210   :  { %v112_v21 = vpop.f32.mrb[0].mxu0 }
 0x211   :  { %v118_v22 = vpack.c.bf16 %v112_v21, %v112_v21  ;;  %v213_v23 = vpop.f32.mrb[1].mxu0 }
 0x212   :  { %v115_v24 = vpop.f32.mrb[2].mxu0 }
 0x213   :  { %v214_v25 = vpop.f32.mrb[3].mxu0  ;;  %218 = vmatmul.mubr.msk.bf16.vlgmr.msra.gmra.mrb[0].mxu1 %vm134_vm3, %v118_v22 }
 0x2e6   :  { %v172_v27 = vpop.f32.mrb[0].mxu1 }
 0x2e7   :  { %v173_v28 = vadd.f32 %v199_v26, %v172_v27  ;;  %v219_v29 = vpop.f32.mrb[1].mxu1 }
 0x2e8   :  { %v175_v30 = vpop.f32.mrb[2].mxu1 }
 0x2e9   :  { %v220_v31 = vpop.f32.mrb[3].mxu1  ;;  %179 = vst.msk [vmem:[#allocation2] sm:$0x3] %vm178_vm4, %v173_v28 }
 0x2ea   :  { %240 = shalt.err (!%p237_p4)
}
 0x2eb   :  { %s241_s5 = scalar_lea.hbm %s330_s6, 32 }
 0x2ec   :  { %p242_p5 = scmp.ne.s32.totalorder %s330_s6, %s241_s5  ;;  %p245_p6 = scmp.lt.u32.totalorder %s241_s5, %s330_s6 }
 0x2ee   :  { %p247_p7 = pnand %p245_p6, %p242_p5 }
 0x2f0   :  { %250 = shalt.err (!%p247_p7)
}
 0x2f1   :  { %189 = dma.vmem_to_hbm [thread:$0]  %s187_s8, 32, %s330_s6, [#allocation3]  }
 0x2f2   :  { %251 = dma.done.wait [#allocation3], 32  }
 0x2f3   :  { %252 = vsyncadd [#allocation3], 4294967264 }
 0x2f4   :  { %193 = vsyncpa [#allocation3], 1 }

// kernel: clip_linear_forward.5
= control target key start
LH: loop header
LB: loop body
LE: loop exit
PB: predicated region body
PF: predicated region fallthrough
CT: control target
= control target key end

     0   :  { %s2331_s25 = smov 0   ;;  %s2631_s0 = inlined_call_operand.vmem [shape: f32[2,24,32], index: 0, kind: input, shape index: {}]   ;;  %s2632_s1 = inlined_call_operand.vmem [shape: f32[1,32], index: 1, kind: input, shape index: {}]   ;;  %s2633_s2 = inlined_call_operand.vmem [shape: f32[1,32], index: 2, kind: input, shape index: {}]   ;;  %s2634_s3 = inlined_call_operand.vmem [shape: bf16[32,96], index: 3, kind: input, shape index: {}]   ;;  %s2635_s4 = inlined_call_operand.vmem [shape: f32[1,96], index: 4, kind: input, shape index: {}]   ;;  %s2636_s5 = inlined_call_operand.vmem [shape: bf16[32,32], index: 5, kind: input, shape index: {}]   ;;  %s2637_s6 = inlined_call_operand.vmem [shape: f32[1,32], index: 6, kind: input, shape index: {}]   ;;  %s2638_s7 = inlined_call_operand.vmem [shape: f32[1,32], index: 7, kind: input, shape index: {}]   ;;  %s2639_s8 = inlined_call_operand.vmem [shape: f32[1,32], index: 8, kind: input, shape index: {}]   ;;  %s2640_s9 = inlined_call_operand.vmem [shape: bf16[32,128], index: 9, kind: input, shape index: {}]   ;;  %s2641_s10 = inlined_call_operand.vmem [shape: f32[1,128], index: 10, kind: input, shape index: {}]   ;;  %s2642_s11 = inlined_call_operand.vmem [shape: bf16[128,32], index: 11, kind: input, shape index: {}]   ;;  %s2643_s12 = inlined_call_operand.vmem [shape: f32[1,32], index: 12, kind: input, shape index: {}]   ;;  %s2644_s13 = inlined_call_operand.vmem [shape: f32[2,24,32], index: 13, kind: output, shape index: {}]  }
   0x1 LB: > { %s1876_s26 = sadd.s32 4294967295, %s2248_s25   ;;  %p1880_p0 = scmp.ge.s32.totalorder %s2248_s25, 1  ;;  %s2248_s25 = sphi %s2331_s25, %s23_s25  }
   0x2   : > { %p387_p1 = scmp.lt.s32.totalorder %s2248_s25, 3 }
   0x4   : > { %p388_p2 = pnand %p1880_p0, %p387_p1 }
   0x5   : > { %p431_p3 = scmp.lt.s32.totalorder (!%p388_p2), %s1876_s26, 1  ;;  %vm447_vm0 = vcmask (!%p388_p2), 261120   ;;  %v2158_v21 = vld [vmem:[%s2634_s3] sm:$0xff] (!%p388_p2)   ;;  %v2159_v22 = vld [vmem:[%s2634_s3 + $0x8] sm:$0xff] (!%p388_p2)   ;;  %s2250_s24 = smov (!%p388_p2), 96   ;;  %vm601_vm1 = vcmask (!%p388_p2), 64512  }
   0x6   : > { %391 = sbr.rel (%p388_p2) target bundleno = 3463 (0xd87), region = 72  ;;  %1998 = vmatprep.subr.bf16.mxu0 (!%p388_p2), %v2158_v21  ;;  %v1883_v34 = vld [vmem:[%s2632_s1] ss:$0 sm:$0xff] (!%p388_p2)  ;;  %s2251_s28 = smov (!%p388_p2), 88   ;;  %vm665_vm3 = vcmask (!%p388_p2), 195584   ;;  %vm712_vm4 = vcmask (!%p388_p2), 1043456  }
   0x7   : > { %1999 = vmatpush3.bf16.msra.mxu0 (!%p388_p2), %v2158_v21  ;;  %v1884_v40 = vld [vmem:[%s2633_s2] ss:$0 sm:$0xff] (!%p388_p2)  ;;  %s2252_s29 = smov (!%p388_p2), 120   ;;  %s2254_s14 = smov (!%p388_p2), 80  }
   0x8   : > { %2000 = vmatprep.subr.bf16.mxu0 (!%p388_p2), %v2159_v22  ;;  %v1885_v48 = vld [vmem:[%s2635_s4] ss:$0 sm:$0xff] (!%p388_p2)  ;;  %s2255_s15 = smov (!%p388_p2), 112   ;;  %s2256_s18 = smov (!%p388_p2), 64  }
   0x9   : > { %s2257_s19 = smov (!%p388_p2), 72   ;;  %s2258_s20 = smov (!%p388_p2), 104  }
   0xa   : > { %s2259_s23 = smov (!%p388_p2), 48  }
   0xb   : > { %2001 = vmatpush3.bf16.msra.mxu0 (!%p388_p2), %v2159_v22 }
   0xd   : > { %s2646_s26 = smov (!%p431_p3, %s1876_s26), 1 }
   0xe   : > { %s2138_s27 = smul.u32 24, %s2646_s26 }
  0x10   : > { %s435_s30 = scalar_lea.vmem %s2631_s0, %s2138_s27 }
  0x11   : > { %v2347_v0 = vld [vmem:[%s435_s30] sm:$0xff]  ;;  %v2349_v1 = vld [vmem:[%s435_s30 + $0x10] sm:$0xff]  ;;  %v2351_v2 = vld [vmem:[%s435_s30 + $0x8] sm:$0xff]  ;;  %s2253_s30 = smov 56  }
  0x12   : > { %v448_v3 = vsel %vm447_vm0, %v2347_v0, 0.0  ;;  %v454_v4 = vsel %vm447_vm0, %v2349_v1, 0.0  ;;  %v451_v5 = vsel %vm447_vm0, %v2351_v2, 0.0 }
  0x13   : > { %449 = vadd.xlane.f32.xlu0 %v448_v3  ;;  %455 = vadd.xlane.f32.xlu1 %v454_v4 }
  0x17   : > { %452 = vadd.xlane.f32.xlu0 %v451_v5 }
  0xa0   : > { %v450_v6 = vpop.xlane.xlu0 %449  ;;  %v456_v7 = vpop.xlane.xlu1 %455 }
  0xa1   : > { %v458_v8 = vmul.f32 0.03125, %v450_v6  ;;  %v460_v9 = vmul.f32 0.03125, %v456_v7 }
  0xa3   : > { %v461_v10 = vsub.f32 %v2347_v0, %v458_v8  ;;  %v463_v11 = vsub.f32 %v2349_v1, %v460_v9 }
  0xa4   : > { %v453_v12 = vpop.xlane.xlu0 %452 }
  0xa5   : > { %v459_v13 = vmul.f32 0.03125, %v453_v12  ;;  %v464_v14 = vmul.f32 %v461_v10, %v461_v10  ;;  %v466_v15 = vmul.f32 %v463_v11, %v463_v11 }
  0xa7   : > { %v462_v16 = vsub.f32 %v2351_v2, %v459_v13  ;;  %v467_v17 = vsel %vm447_vm0, %v464_v14, 0.0  ;;  %v473_v18 = vsel %vm447_vm0, %v466_v15, 0.0 }
  0xa8   : > { %468 = vadd.xlane.f32.xlu1 %v467_v17 }
  0xa9   : > { %v465_v19 = vmul.f32 %v462_v16, %v462_v16 }
  0xab   : > { %v470_v20 = vsel %vm447_vm0, %v465_v19, 0.0 }
  0xac   : > { %474 = vadd.xlane.f32.xlu1 %v473_v18  ;;  %471 = vadd.xlane.f32.xlu0 %v470_v20 }
 0x135   : > { %v469_v23 = vpop.xlane.xlu1 %468 }
 0x136   : > { %v476_v24 = vmul.f32 0.03125, %v469_v23 }
 0x138   : > { %v479_v25 = vadd.f32 1e-05, %v476_v24 }
 0x139   : > { %v475_v26 = vpop.xlane.xlu1 %474  ;;  %v472_v27 = vpop.xlane.xlu0 %471 }
 0x13a   : > { %2170 = vrsqrt.f32 %v479_v25  ;;  %v478_v28 = vmul.f32 0.03125, %v475_v26  ;;  %v477_v29 = vmul.f32 0.03125, %v472_v27 }
 0x13c   : > { %v481_v30 = vadd.f32 1e-05, %v478_v28  ;;  %v480_v31 = vadd.f32 1e-05, %v477_v29 }
 0x13e   : > { %2172 = vrsqrt.f32 %v481_v30 }
 0x13f   : > { %2174 = vrsqrt.f32 %v480_v31 }
 0x144   : > { %v2171_v32 = vpop.eup %2170 }
 0x145   : > { %v485_v33 = vmul.f32 %v2171_v32, %v461_v10 }
 0x147   : > { %v494_v39 = vmul.f32 %v1883_v34, %v485_v33 }
 0x148   : > { %v2173_v35 = vpop.eup %2172 }
 0x149   : > { %v2175_v36 = vpop.eup %2174  ;;  %v487_v37 = vmul.f32 %v2173_v35, %v463_v11  ;;  %v503_v44 = vadd.f32 %v1884_v40, %v494_v39 }
 0x14a   : > { %v486_v38 = vmul.f32 %v2175_v36, %v462_v16  ;;  %v585_v16 = vlaneseq }
 0x14b   : > { %v496_v41 = vmul.f32 %v1883_v34, %v487_v37 }
 0x14c   : > { %v495_v42 = vmul.f32 %v1883_v34, %v486_v38  ;;  %v2410_v17 = vand.u32 127, %v585_v16 }
 0x14d   : > { %v505_v43 = vadd.f32 %v1884_v40, %v496_v41 }
 0x14e   : > { %v504_v45 = vadd.f32 %v1884_v40, %v495_v42  ;;  %vm587_vm2 = vcmp.lt.s32.totalorder %v2410_v17, 17 }
 0x14f   : > { %v507_v46 = vpack.c.bf16 %v505_v43, %v505_v43 }
 0x150   : > { %v506_v47 = vpack.c.bf16 %v504_v45, %v503_v44 }
 0x152   : > { %2002 = vmatprep.mubr.msk.bf16.mxu0 %vm447_vm0, %v506_v47 }
 0x153   : > { %2003 = vmatmul.mubr.msk.bf16.vlgmr.msra.gmra.mrb[0].mxu0 %vm447_vm0, %v507_v46 }
 0x226   : > { %v2004_v49 = vpop.f32.mrb[0].mxu0 }
 0x227   : > { %v580_v50 = vadd.f32 %v2004_v49, %v1885_v48  ;;  %v571_v51 = vpop.f32.mrb[1].mxu0 }
 0x228   : > { %v572_v52 = vadd.f32 %v1885_v48, %v571_v51  ;;  %v2005_v53 = vpop.f32.mrb[2].mxu0 }
 0x229   : > { %v2382_v54 = vpack.c.bf16 %v580_v50, %v580_v50  ;;  %v574_v55 = vpop.f32.mrb[3].mxu0  ;;  %v590_v61 = vmul.f32 0.35355338, %v580_v50 }
 0x22a   : > { %v575_v56 = vadd.f32 %v1885_v48, %v574_v55  ;;  %v588_v57 = vmul.f32 0.35355338, %v572_v52  ;;  %v937_v55 = vld [vmem:[%s2636_s5 + $0x4] sm:$0xf] }
 0x22b   : > { %599 = vrot.lane.b32.xlu1 %v2382_v54, %s2250_s24  ;;  %v2395_v62 = vpack.c.bf16 %v590_v61, %v590_v61 }
 0x22c   : > { %v589_v58 = vmul.f32 0.35355338, %v575_v56  ;;  %v2385_v59 = vpack.c.bf16 %v575_v56, %v572_v52 }
 0x22e   : > { %v2387_v60 = vpack.c.bf16 %v589_v58, %v588_v57  ;;  %597 = vrot.lane.b32.xlu0 %v2385_v59, %s2250_s24 }
 0x22f   : > { %773 = vrot.lane.b32.xlu1 %v2385_v59, %s2251_s28 }
 0x230   : > { %2010 = vmatprep.mubr.msk.bf16.mxu1 %vm601_vm1, %v2387_v60 }
 0x232   : > { %769 = vrot.lane.b32.xlu0 %v2387_v60, %s2252_s29 }
 0x233   : > { %775 = vrot.lane.b32.xlu1 %v2382_v54, %s2251_s28 }
 0x237   : > { %771 = vrot.lane.b32.xlu1 %v2395_v62, %s2252_s29  ;;  %s2260_s29 = smov 40  }
 0x29d   : > { %v600_v4 = vpop.permute.xlu1 %599 }
 0x29e   : > { %v612_v5 = vsel %vm601_vm1, %v600_v4, 0 }
 0x2a0   : > { %v598_v63 = vpop.permute.xlu0 %597 }
 0x2a1   : > { %2122 = vmatprep.subr.msk.bf16.mxu1 %vm601_vm1, %v598_v63  ;;  %v609_v3 = vsel %vm601_vm1, %v598_v63, 0  ;;  %v774_v6 = vpop.permute.xlu1 %773 }
 0x2a2   : > { %2007 = vmatpush3.bf16.xpose.msra.mxu1 %v609_v3  ;;  %v784_v7 = vsel %vm601_vm1, %v774_v6, 0 }
 0x2a3   : > { %2123 = vmatprep.subr.msk.bf16.mxu1 %vm601_vm1, %v600_v4 }
 0x2a4   : > { %v770_v8 = vpop.permute.xlu0 %769 }
 0x2a5   : > { %v776_v9 = vpop.permute.xlu1 %775 }
 0x2a6   : > { %v787_v10 = vsel %vm601_vm1, %v776_v9, 0 }
 0x2a9   : > { %v772_v11 = vpop.permute.xlu1 %771 }
 0x2aa   : > { %2009 = vmatpush3.bf16.xpose.msra.mxu1 %v612_v5 }
 0x2ab   : > { %2125 = vmatprep.subr.msk.bf16.mxu1 %vm601_vm1, %v774_v6 }
 0x2b1   : > { %2011 = vmatmul.mubr.msk.bf16.vlgmr.msra.gmra.mrb[0].mxu1 %vm601_vm1, %v2395_v62 }
 0x2b2   : > { %2023 = vmatpush3.bf16.xpose.msra.mxu1 %v784_v7  ;;  %2026 = vmatprep.mubr.msk.bf16.mxu1 %vm601_vm1, %v770_v8  ;;  %v947_v7 = vsel %vm712_vm4, %v937_v55, 0 }
 0x2b3   : > { %2126 = vmatprep.subr.msk.bf16.mxu1 %vm601_vm1, %v776_v9 }
 0x2ba   : > { %2025 = vmatpush3.bf16.xpose.msra.mxu1 %v787_v10 }
 0x2c1   : > { %2027 = vmatmul.mubr.msk.bf16.vlgmr.msra.gmra.mrb[4].mxu1 %vm601_vm1, %v772_v11 }
 0x384   : > { %v2012_v12 = vpop.f32.mrb[0].mxu1 }
 0x385   : > { %v648_v13 = vpop.f32.mrb[1].mxu1  ;;  %v664_v45 = vsel %vm587_vm2, %v2012_v12, -1e+30 }
 0x386   : > { %v2013_v14 = vpop.f32.mrb[2].mxu1  ;;  %v662_v43 = vsel %vm587_vm2, %v648_v13, -1e+30  ;;  %v672_v46 = vsel %vm665_vm3, %v664_v45, -inf }
 0x387   : > { %v651_v15 = vpop.f32.mrb[3].mxu1  ;;  %v666_v44 = vsel %vm665_vm3, %v662_v43, -inf }
 0x388   : > { %v663_v47 = vsel %vm587_vm2, %v651_v15, -1e+30 }
 0x389   : > { %v669_v48 = vsel %vm665_vm3, %v663_v47, -inf }
 0x394   : > { %v2028_v18 = vpop.f32.mrb[4].mxu1 }
 0x395   : > { %v823_v19 = vpop.f32.mrb[5].mxu1  ;;  %v839_v24 = vsel %vm587_vm2, %v2028_v18, -1e+30 }
 0x396   : > { %v837_v20 = vsel %vm587_vm2, %v823_v19, -1e+30  ;;  %v2029_v21 = vpop.f32.mrb[6].mxu1  ;;  %v846_v27 = vsel %vm665_vm3, %v839_v24, -inf }
 0x397   : > { %v826_v22 = vpop.f32.mrb[7].mxu1  ;;  %v840_v23 = vsel %vm665_vm3, %v837_v20, -inf }
 0x398   : > { %v838_v25 = vsel %vm587_vm2, %v826_v22, -1e+30  ;;  %841 = vmax.xlane.f32.xlu0 %v840_v23 }
 0x399   : > { %v843_v26 = vsel %vm665_vm3, %v838_v25, -inf }
 0x39a   : > { %844 = vmax.xlane.f32.xlu1 %v843_v26 }
 0x39c   : > { %847 = vmax.xlane.f32.xlu0 %v846_v27 }
 0x425   : > { %v842_v28 = vpop.xlane.xlu0 %841 }
 0x426   : > { %v849_v29 = vsub.f32 %v837_v20, %v842_v28 }
 0x427   : > { %v845_v30 = vpop.xlane.xlu1 %844 }
 0x428   : > { %v852_v31 = vmul.f32 1.442695, %v849_v29  ;;  %v850_v32 = vsub.f32 %v838_v25, %v845_v30 }
 0x429   : > { %v848_v33 = vpop.xlane.xlu0 %847 }
 0x42a   : > { %2176 = vpow2.f32 %v852_v31  ;;  %v854_v34 = vmul.f32 1.442695, %v850_v32  ;;  %v851_v35 = vsub.f32 %v839_v24, %v848_v33 }
 0x42c   : > { %2178 = vpow2.f32 %v854_v34  ;;  %v856_v36 = vmul.f32 1.442695, %v851_v35 }
 0x42e   : > { %2180 = vpow2.f32 %v856_v36 }
 0x434   : > { %v2177_v37 = vpop.eup %2176 }
 0x435   : > { %v858_v38 = vsel %vm665_vm3, %v2177_v37, 0.0 }
 0x436   : > { %v2179_v39 = vpop.eup %2178  ;;  %859 = vadd.xlane.f32.xlu0 %v858_v38 }
 0x437   : > { %v861_v42 = vsel %vm665_vm3, %v2179_v39, 0.0 }
 0x438   : > { %v2181_v40 = vpop.eup %2180 }
 0x439   : > { %v864_v41 = vsel %vm665_vm3, %v2181_v40, 0.0 }
 0x43a   : > { %865 = vadd.xlane.f32.xlu1 %v864_v41  ;;  %862 = vadd.xlane.f32.xlu0 %v861_v42 }
 0x44b   : > { %877 = vrot.lane.b32.xlu1 %v2382_v54, %s2253_s30 }
 0x44f   : > { %1058 = vrot.lane.b32.xlu1 %v2385_v59, %s2254_s14 }
 0x450   : > { %875 = vrot.lane.b32.xlu0 %v2385_v59, %s2253_s30 }
 0x453   : > { %1060 = vrot.lane.b32.xlu1 %v2382_v54, %s2254_s14 }
 0x454   : > { %1054 = vrot.lane.b32.xlu0 %v2387_v60, %s2255_s15 }
 0x457   : > { %1056 = vrot.lane.b32.xlu1 %v2395_v62, %s2255_s15 }
 0x473   : > { %667 = vmax.xlane.f32.xlu0 %v666_v44 }
 0x477   : > { %673 = vmax.xlane.f32.xlu0 %v672_v46 }
 0x47b   : > { %670 = vmax.xlane.f32.xlu1 %v669_v48 }
 0x4c3   : > { %v860_v49 = vpop.xlane.xlu0 %859 }
 0x4c4   : > { %2182 = vrcp.f32 %v860_v49 }
 0x4c7   : > { %v863_v50 = vpop.xlane.xlu0 %862  ;;  %v866_v51 = vpop.xlane.xlu1 %865 }
 0x4c8   : > { %2184 = vrcp.f32 %v863_v50 }
 0x4c9   : > { %2186 = vrcp.f32 %v866_v51 }
 0x4cb   : > { %v876_v52 = vpop.permute.xlu0 %875  ;;  %v878_v53 = vpop.permute.xlu1 %877 }
 0x4cc   : > { %2030 = vmatprep.subr.bf16.mxu1 %v876_v52  ;;  %v887_v57 = vsel %vm712_vm4, %v878_v53, 0 }
 0x4cd   : > { %2031 = vmatpush3.bf16.msra.mxu1 %v876_v52 }
 0x4ce   : > { %2127 = vmatprep.subr.msk.bf16.mxu1 %vm712_vm4, %v878_v53  ;;  %v2183_v56 = vpop.eup %2182 }
 0x4cf   : > { %v870_v63 = vmul.f32 %v2183_v56, %v2177_v37  ;;  %v1059_v8 = vpop.permute.xlu1 %1058  ;;  %v1055_v9 = vpop.permute.xlu0 %1054 }
 0x4d0   : > { %v1069_v42 = vsel %vm601_vm1, %v1059_v8, 0 }
 0x4d1   : > { %2033 = vmatpush3.bf16.msra.mxu1 %v887_v57 }
 0x4d2   : > { %v2185_v58 = vpop.eup %2184  ;;  %2128 = vmatprep.subr.msk.bf16.mxu1 %vm712_vm4, %v937_v55  ;;  %v764_v55 = vld [vmem:[%s2636_s5] sm:$0xf] }
 0x4d3   : > { %v2187_v61 = vpop.eup %2186  ;;  %v871_v3 = vmul.f32 %v2185_v58, %v2179_v39  ;;  %v2450_v10 = vpop.permute.xlu1 %1060  ;;  %v1004_v56 = vsel %vm712_vm4, %v764_v55, 0 }
 0x4d4   : > { %v872_v4 = vmul.f32 %v2187_v61, %v2181_v40 }
 0x4d5   : > { %v873_v5 = vpack.c.bf16 %v871_v3, %v870_v63 }
 0x4d6   : > { %v874_v6 = vpack.c.bf16 %v872_v4, %v872_v4 }
 0x4d7   : > { %2034 = vmatprep.mubr.msk.bf16.mxu1 %vm665_vm3, %v873_v5  ;;  %v2452_v14 = vpop.permute.xlu1 %1056 }
 0x4d8   : > { %2035 = vmatmul.mubr.msk.bf16.vlgmr.msra.gmra.mrb[8].mxu1 %vm665_vm3, %v874_v6 }
 0x4d9   : > { %2039 = vmatpush3.bf16.msra.mxu1 %v947_v7 }
 0x4da   : > { %2130 = vmatprep.subr.msk.bf16.mxu1 %vm601_vm1, %v1059_v8 }
 0x500   : > { %v668_v11 = vpop.xlane.xlu0 %667 }
 0x501   : > { %v675_v12 = vsub.f32 %v662_v43, %v668_v11 }
 0x503   : > { %v678_v13 = vmul.f32 1.442695, %v675_v12 }
 0x504   : > { %v674_v15 = vpop.xlane.xlu0 %673 }
 0x505   : > { %2188 = vpow2.f32 %v678_v13  ;;  %v677_v16 = vsub.f32 %v664_v45, %v674_v15 }
 0x507   : > { %v682_v18 = vmul.f32 1.442695, %v677_v16 }
 0x508   : > { %v671_v19 = vpop.xlane.xlu1 %670 }
 0x509   : > { %2190 = vpow2.f32 %v682_v18  ;;  %v676_v20 = vsub.f32 %v663_v47, %v671_v19  ;;  %v1072_v47 = vsel %vm601_vm1, %v2450_v10, 0 }
 0x50b   : > { %v680_v21 = vmul.f32 1.442695, %v676_v20 }
 0x50d   : > { %2192 = vpow2.f32 %v680_v21 }
 0x50f   : > { %v2189_v22 = vpop.eup %2188 }
 0x510   : > { %v684_v23 = vsel %vm665_vm3, %v2189_v22, 0.0 }
 0x511   : > { %685 = vadd.xlane.f32.xlu0 %v684_v23 }
 0x513   : > { %v2191_v24 = vpop.eup %2190 }
 0x514   : > { %v690_v25 = vsel %vm665_vm3, %v2191_v24, 0.0 }
 0x515   : > { %691 = vadd.xlane.f32.xlu1 %v690_v25 }
 0x517   : > { %v2193_v26 = vpop.eup %2192 }
 0x518   : > { %v687_v27 = vsel %vm665_vm3, %v2193_v26, 0.0 }
 0x519   : > { %688 = vadd.xlane.f32.xlu0 %v687_v27 }
 0x526   : > { %703 = vrot.lane.b32.xlu1 %v2382_v54, %s2256_s18 }
 0x52a   : > { %1289 = vrot.lane.b32.xlu1 %v2385_v59, %s2257_s19 }
 0x52e   : > { %1291 = vrot.lane.b32.xlu1 %v2382_v54, %s2257_s19  ;;  %s440_s19 = scalar_lea.vmem %s2644_s13, %s2138_s27 }
 0x52f   : > { %701 = vrot.lane.b32.xlu0 %v2385_v59, %s2256_s18 }
 0x532   : > { %1287 = vrot.lane.b32.xlu1 %v2395_v62, %s2258_s20 }
 0x533   : > { %1285 = vrot.lane.b32.xlu0 %v2387_v60, %s2258_s20 }
 0x59e   : > { %v686_v28 = vpop.xlane.xlu0 %685 }
 0x5a2   : > { %v692_v29 = vpop.xlane.xlu1 %691 }
 0x5a3   : > { %2194 = vrcp.f32 %v692_v29 }
 0x5a4   : > { %2196 = vrcp.f32 %v686_v28 }
 0x5a6   : > { %v689_v30 = vpop.xlane.xlu0 %688  ;;  %v704_v33 = vpop.permute.xlu1 %703 }
 0x5a7   : > { %2198 = vrcp.f32 %v689_v30  ;;  %v714_v60 = vsel %vm712_vm4, %v704_v33, 0 }
 0x5aa   : > { %v702_v31 = vpop.permute.xlu0 %701  ;;  %v1290_v48 = vpop.permute.xlu1 %1289 }
 0x5ab   : > { %2014 = vmatprep.subr.bf16.mxu0 %v702_v31  ;;  %v2036_v32 = vpop.f32.mrb[8].mxu1  ;;  %v1300_v49 = vsel %vm601_vm1, %v1290_v48, 0 }
 0x5ac   : > { %2015 = vmatpush3.bf16.msra.mxu0 %v702_v31  ;;  %v923_v34 = vpop.f32.mrb[9].mxu1  ;;  %v939_v39 = vpack.c.bf16 %v2036_v32, %v2036_v32 }
 0x5ad   : > { %2124 = vmatprep.subr.msk.bf16.mxu0 %vm712_vm4, %v704_v33  ;;  %v2037_v35 = vpop.f32.mrb[10].mxu1  ;;  %v2195_v36 = vpop.eup %2194 }
 0x5ae   : > { %v926_v37 = vpop.f32.mrb[11].mxu1  ;;  %v2197_v62 = vpop.eup %2196  ;;  %v698_v41 = vmul.f32 %v2195_v36, %v2191_v24 }
 0x5af   : > { %v938_v38 = vpack.c.bf16 %v926_v37, %v923_v34  ;;  %v696_v43 = vmul.f32 %v2197_v62, %v2189_v22  ;;  %v1286_v50 = vpop.permute.xlu0 %1285  ;;  %v1292_v51 = vpop.permute.xlu1 %1291 }
 0x5b0   : > { %2017 = vmatpush3.bf16.msra.mxu0 %v714_v60  ;;  %v700_v46 = vpack.c.bf16 %v698_v41, %v698_v41  ;;  %v1303_v52 = vsel %vm601_vm1, %v1292_v51, 0 }
 0x5b1   : > { %v2199_v40 = vpop.eup %2198  ;;  %2040 = vmatprep.mubr.msk.bf16.mxu1 %vm601_vm1, %v938_v38  ;;  %2129 = vmatprep.subr.msk.bf16.mxu0 %vm712_vm4, %v764_v55 }
 0x5b2   : > { %2041 = vmatmul.mubr.msk.bf16.vlgmr.msra.gmra.mrb[12].mxu1 %vm601_vm1, %v939_v39  ;;  %v697_v44 = vmul.f32 %v2199_v40, %v2193_v26 }
 0x5b3   : > { %2051 = vmatpush3.bf16.xpose.msra.mxu1 %v1069_v42  ;;  %2054 = vmatprep.mubr.msk.bf16.mxu1 %vm601_vm1, %v1055_v9  ;;  %v1288_v53 = vpop.permute.xlu1 %1287 }
 0x5b4   : > { %2131 = vmatprep.subr.msk.bf16.mxu1 %vm601_vm1, %v2450_v10  ;;  %v699_v45 = vpack.c.bf16 %v697_v44, %v696_v43 }
 0x5b6   : > { %2018 = vmatprep.mubr.msk.bf16.mxu0 %vm665_vm3, %v699_v45 }
 0x5b7   : > { %2019 = vmatmul.mubr.msk.bf16.vlgmr.msra.gmra.mrb[4].mxu0 %vm665_vm3, %v700_v46 }
 0x5b8   : > { %2045 = vmatpush3.bf16.msra.mxu0 %v1004_v56 }
 0x5bb   : > { %2053 = vmatpush3.bf16.xpose.msra.mxu1 %v1072_v47 }
 0x5bc   : > { %2134 = vmatprep.subr.msk.bf16.mxu1 %vm601_vm1, %v1290_v48 }
 0x5c2   : > { %2055 = vmatmul.mubr.msk.bf16.vlgmr.msra.gmra.mrb[16].mxu1 %vm601_vm1, %v2452_v14 }
 0x5c3   : > { %2073 = vmatpush3.bf16.xpose.msra.mxu1 %v1300_v49  ;;  %2076 = vmatprep.mubr.msk.bf16.mxu1 %vm601_vm1, %v1286_v50 }
 0x5c4   : > { %2135 = vmatprep.subr.msk.bf16.mxu1 %vm601_vm1, %v1292_v51 }
 0x5cb   : > { %2075 = vmatpush3.bf16.xpose.msra.mxu1 %v1303_v52 }
 0x5d2   : > { %2077 = vmatmul.mubr.msk.bf16.vlgmr.msra.gmra.mrb[20].mxu1 %vm601_vm1, %v1288_v53 }
 0x685   : > { %v2042_v57 = vpop.f32.mrb[12].mxu1 }
 0x686   : > { %v983_v58 = vpop.f32.mrb[13].mxu1 }
 0x687   : > { %v2043_v61 = vpop.f32.mrb[14].mxu1 }
 0x688   : > { %v986_v63 = vpop.f32.mrb[15].mxu1 }
 0x68a   : > { %v2020_v3 = vpop.f32.mrb[4].mxu0 }
 0x68b   : > { %v750_v4 = vpop.f32.mrb[5].mxu0  ;;  %v766_v8 = vpack.c.bf16 %v2020_v3, %v2020_v3 }
 0x68c   : > { %v2021_v5 = vpop.f32.mrb[6].mxu0 }
 0x68d   : > { %v753_v6 = vpop.f32.mrb[7].mxu0 }
 0x68e   : > { %v765_v7 = vpack.c.bf16 %v753_v6, %v750_v4 }
 0x690   : > { %2046 = vmatprep.mubr.msk.bf16.mxu0 %vm601_vm1, %v765_v7 }
 0x691   : > { %2047 = vmatmul.mubr.msk.bf16.vlgmr.msra.gmra.mrb[8].mxu0 %vm601_vm1, %v766_v8 }
 0x695   : > { %v2056_v9 = vpop.f32.mrb[16].mxu1 }
 0x696   : > { %v1108_v10 = vpop.f32.mrb[17].mxu1  ;;  %v1124_v15 = vsel %vm587_vm2, %v2056_v9, -1e+30 }
 0x697   : > { %v1122_v11 = vsel %vm587_vm2, %v1108_v10, -1e+30  ;;  %v2057_v12 = vpop.f32.mrb[18].mxu1  ;;  %v1131_v19 = vsel %vm665_vm3, %v1124_v15, -inf }
 0x698   : > { %v1111_v13 = vpop.f32.mrb[19].mxu1  ;;  %v1125_v14 = vsel %vm665_vm3, %v1122_v11, -inf }
 0x699   : > { %v1123_v16 = vsel %vm587_vm2, %v1111_v13, -1e+30  ;;  %1126 = vmax.xlane.f32.xlu0 %v1125_v14 }
 0x69a   : > { %v1128_v18 = vsel %vm665_vm3, %v1123_v16, -inf }
 0x69b   : > { %1129 = vmax.xlane.f32.xlu1 %v1128_v18 }
 0x69d   : > { %1132 = vmax.xlane.f32.xlu0 %v1131_v19 }
 0x6a5   : > { %v2078_v20 = vpop.f32.mrb[20].mxu1 }
 0x6a6   : > { %v1339_v21 = vpop.f32.mrb[21].mxu1  ;;  %v1355_v48 = vsel %vm587_vm2, %v2078_v20, -1e+30 }
 0x6a7   : > { %v2079_v22 = vpop.f32.mrb[22].mxu1  ;;  %v1353_v44 = vsel %vm587_vm2, %v1339_v21, -1e+30  ;;  %v1362_v49 = vsel %vm665_vm3, %v1355_v48, -inf }
 0x6a8   : > { %v1342_v23 = vpop.f32.mrb[23].mxu1  ;;  %v1356_v46 = vsel %vm665_vm3, %v1353_v44, -inf  ;;  %v1222_v22 = vld [vmem:[%s2636_s5 + $0x8] sm:$0xf] }
 0x6a9   : > { %v1354_v45 = vsel %vm587_vm2, %v1342_v23, -1e+30  ;;  %v1232_v23 = vsel %vm712_vm4, %v1222_v22, 0 }
 0x6aa   : > { %v1359_v47 = vsel %vm665_vm3, %v1354_v45, -inf }
 0x726   : > { %v1127_v24 = vpop.xlane.xlu0 %1126 }
 0x727   : > { %v1134_v25 = vsub.f32 %v1122_v11, %v1127_v24 }
 0x728   : > { %v1130_v26 = vpop.xlane.xlu1 %1129 }
 0x729   : > { %v1137_v27 = vmul.f32 1.442695, %v1134_v25  ;;  %v1135_v28 = vsub.f32 %v1123_v16, %v1130_v26 }
 0x72a   : > { %v1133_v29 = vpop.xlane.xlu0 %1132 }
 0x72b   : > { %2200 = vpow2.f32 %v1137_v27  ;;  %v1139_v30 = vmul.f32 1.442695, %v1135_v28  ;;  %v1136_v31 = vsub.f32 %v1124_v15, %v1133_v29 }
 0x72d   : > { %2202 = vpow2.f32 %v1139_v30  ;;  %v1141_v32 = vmul.f32 1.442695, %v1136_v31 }
 0x72f   : > { %2204 = vpow2.f32 %v1141_v32 }
 0x735   : > { %v2201_v33 = vpop.eup %2200 }
 0x736   : > { %v1143_v34 = vsel %vm665_vm3, %v2201_v33, 0.0 }
 0x737   : > { %v2203_v35 = vpop.eup %2202  ;;  %1144 = vadd.xlane.f32.xlu0 %v1143_v34 }
 0x738   : > { %v1146_v62 = vsel %vm665_vm3, %v2203_v35, 0.0 }
 0x739   : > { %v2205_v36 = vpop.eup %2204 }
 0x73a   : > { %v1149_v37 = vsel %vm665_vm3, %v2205_v36, 0.0 }
 0x73b   : > { %1150 = vadd.xlane.f32.xlu1 %v1149_v37  ;;  %1147 = vadd.xlane.f32.xlu0 %v1146_v62 }
 0x74c   : > { %1162 = vrot.lane.b32.xlu1 %v2382_v54, %s2259_s23 }
 0x751   : > { %1160 = vrot.lane.b32.xlu0 %v2385_v59, %s2259_s23 }
 0x764   : > { %v2048_v60 = vpop.f32.mrb[8].mxu0 }
 0x765   : > { %v2504_v38 = vadd.f32 %v2048_v60, %v2042_v57  ;;  %v1040_v39 = vpop.f32.mrb[9].mxu0 }
 0x766   : > { %v2506_v40 = vadd.f32 %v1040_v39, %v983_v58  ;;  %v2049_v41 = vpop.f32.mrb[10].mxu0 }
 0x767   : > { %v1043_v42 = vpop.f32.mrb[11].mxu0 }
 0x768   : > { %v2508_v43 = vadd.f32 %v1043_v42, %v986_v63  ;;  %v1453_v42 = vld [vmem:[%s2636_s5 + $0xc] sm:$0xf] }
 0x770   : > { %1357 = vmax.xlane.f32.xlu1 %v1356_v46  ;;  %1360 = vmax.xlane.f32.xlu0 %v1359_v47 }
 0x774   : > { %1363 = vmax.xlane.f32.xlu0 %v1362_v49 }
 0x7c4   : > { %v1145_v50 = vpop.xlane.xlu0 %1144 }
 0x7c5   : > { %2206 = vrcp.f32 %v1145_v50 }
 0x7c8   : > { %v1148_v51 = vpop.xlane.xlu0 %1147  ;;  %v1151_v52 = vpop.xlane.xlu1 %1150 }
 0x7c9   : > { %2208 = vrcp.f32 %v1148_v51 }
 0x7ca   : > { %2210 = vrcp.f32 %v1151_v52 }
 0x7cc   : > { %v1161_v53 = vpop.permute.xlu0 %1160  ;;  %v1163_v55 = vpop.permute.xlu1 %1162 }
 0x7cd   : > { %2058 = vmatprep.subr.bf16.mxu0 %v1161_v53  ;;  %v1172_v17 = vsel %vm712_vm4, %v1163_v55, 0 }
 0x7ce   : > { %2059 = vmatpush3.bf16.msra.mxu0 %v1161_v53 }
 0x7cf   : > { %2132 = vmatprep.subr.msk.bf16.mxu0 %vm712_vm4, %v1163_v55  ;;  %v2207_v56 = vpop.eup %2206 }
 0x7d0   : > { %v1155_v61 = vmul.f32 %v2207_v56, %v2201_v33 }
 0x7d2   : > { %2061 = vmatpush3.bf16.msra.mxu0 %v1172_v17 }
 0x7d3   : > { %v2209_v57 = vpop.eup %2208  ;;  %2133 = vmatprep.subr.msk.bf16.mxu0 %vm712_vm4, %v1222_v22 }
 0x7d4   : > { %v2211_v58 = vpop.eup %2210  ;;  %v1156_v63 = vmul.f32 %v2209_v57, %v2203_v35 }
 0x7d5   : > { %v1157_v3 = vmul.f32 %v2211_v58, %v2205_v36 }
 0x7d6   : > { %v1158_v4 = vpack.c.bf16 %v1156_v63, %v1155_v61 }
 0x7d7   : > { %v1159_v5 = vpack.c.bf16 %v1157_v3, %v1157_v3 }
 0x7d8   : > { %2062 = vmatprep.mubr.msk.bf16.mxu0 %vm665_vm3, %v1158_v4 }
 0x7d9   : > { %2063 = vmatmul.mubr.msk.bf16.vlgmr.msra.gmra.mrb[12].mxu0 %vm665_vm3, %v1159_v5 }
 0x7da   : > { %2067 = vmatpush3.bf16.msra.mxu0 %v1232_v23 }
 0x7fd   : > { %v1361_v6 = vpop.xlane.xlu0 %1360  ;;  %v1358_v7 = vpop.xlane.xlu1 %1357 }
 0x7fe   : > { %v1366_v8 = vsub.f32 %v1354_v45, %v1361_v6  ;;  %v1365_v10 = vsub.f32 %v1353_v44, %v1358_v7  ;;  %v1463_v44 = vsel %vm712_vm4, %v1453_v42, 0 }
 0x800   : > { %v1370_v9 = vmul.f32 1.442695, %v1366_v8  ;;  %v1368_v13 = vmul.f32 1.442695, %v1365_v10 }
 0x801   : > { %v1364_v11 = vpop.xlane.xlu0 %1363 }
 0x802   : > { %2212 = vpow2.f32 %v1370_v9  ;;  %v1367_v12 = vsub.f32 %v1355_v48, %v1364_v11 }
 0x804   : > { %v1372_v14 = vmul.f32 1.442695, %v1367_v12 }
 0x806   : > { %2214 = vpow2.f32 %v1372_v14 }
 0x807   : > { %2216 = vpow2.f32 %v1368_v13 }
 0x80c   : > { %v2213_v15 = vpop.eup %2212 }
 0x80d   : > { %v1377_v16 = vsel %vm665_vm3, %v2213_v15, 0.0 }
 0x80e   : > { %1378 = vadd.xlane.f32.xlu0 %v1377_v16 }
 0x810   : > { %v2215_v18 = vpop.eup %2214 }
 0x811   : > { %v1380_v19 = vsel %vm665_vm3, %v2215_v18, 0.0  ;;  %v2217_v20 = vpop.eup %2216 }
 0x812   : > { %1381 = vadd.xlane.f32.xlu1 %v1380_v19  ;;  %v1374_v21 = vsel %vm665_vm3, %v2217_v20, 0.0 }
 0x816   : > { %1375 = vadd.xlane.f32.xlu1 %v1374_v21 }
 0x824   : > { %1391 = vrot.lane.b32.xlu0 %v2385_v59, %s2260_s29 }
 0x827   : > { %1393 = vrot.lane.b32.xlu1 %v2382_v54, %s2260_s29 }
 0x89b   : > { %v1379_v24 = vpop.xlane.xlu0 %1378 }
 0x89c   : > { %2218 = vrcp.f32 %v1379_v24 }
 0x89f   : > { %v1392_v25 = vpop.permute.xlu0 %1391  ;;  %v1382_v26 = vpop.xlane.xlu1 %1381 }
 0x8a0   : > { %2080 = vmatprep.subr.bf16.mxu0 %v1392_v25 }
 0x8a3   : > { %v1376_v27 = vpop.xlane.xlu1 %1375 }
 0x8a4   : > { %2220 = vrcp.f32 %v1376_v27  ;;  %v2160_v27 = vld [vmem:[%s2640_s9] sm:$0xff]  }
 0x8a5   : > { %2222 = vrcp.f32 %v1382_v26  ;;  %2094 = vmatprep.subr.bf16.mxu1 %v2160_v27 }
 0x8a6   : > { %v2219_v28 = vpop.eup %2218  ;;  %2095 = vmatpush3.bf16.msra.mxu1 %v2160_v27 }
 0x8a7   : > { %v1387_v35 = vmul.f32 %v2219_v28, %v2213_v15  ;;  %v1394_v62 = vpop.permute.xlu1 %1393  ;;  %v2161_v28 = vld [vmem:[%s2640_s9 + $0x8] sm:$0xff]  }
 0x8a8   : > { %v1403_v39 = vsel %vm712_vm4, %v1394_v62, 0  ;;  %2096 = vmatprep.subr.bf16.mxu1 %v2161_v28 }
 0x8aa   : > { %2097 = vmatpush3.bf16.msra.mxu1 %v2161_v28 }
 0x8ac   : > { %v2064_v29 = vpop.f32.mrb[12].mxu0 }
 0x8ad   : > { %v1208_v30 = vpop.f32.mrb[13].mxu0  ;;  %v1224_v59 = vpack.c.bf16 %v2064_v29, %v2064_v29 }
 0x8ae   : > { %v2221_v31 = vpop.eup %2220  ;;  %v2065_v32 = vpop.f32.mrb[14].mxu0 }
 0x8af   : > { %v1211_v33 = vpop.f32.mrb[15].mxu0  ;;  %v1386_v34 = vmul.f32 %v2221_v31, %v2217_v20  ;;  %v2223_v54 = vpop.eup %2222 }
 0x8b0   : > { %v1223_v36 = vpack.c.bf16 %v1211_v33, %v1208_v30  ;;  %v1388_v60 = vmul.f32 %v2223_v54, %v2215_v18  ;;  %v1915_v54 = vld [vmem:[%s2638_s7] ss:$0 sm:$0xff] }
 0x8b1   : > { %v1389_v37 = vpack.c.bf16 %v1387_v35, %v1386_v34 }
 0x8b2   : > { %2068 = vmatprep.mubr.msk.bf16.mxu0 %vm601_vm1, %v1223_v36  ;;  %v1390_v41 = vpack.c.bf16 %v1388_v60, %v1388_v60 }
 0x8b3   : > { %2069 = vmatmul.mubr.msk.bf16.vlgmr.msra.gmra.mrb[16].mxu0 %vm601_vm1, %v1224_v59 }
 0x8b4   : > { %2081 = vmatpush3.bf16.msra.mxu0 %v1392_v25  ;;  %2084 = vmatprep.mubr.msk.bf16.mxu0 %vm665_vm3, %v1389_v37 }
 0x8b5   : > { %2136 = vmatprep.subr.msk.bf16.mxu0 %vm712_vm4, %v1394_v62 }
 0x8b8   : > { %2083 = vmatpush3.bf16.msra.mxu0 %v1403_v39 }
 0x8b9   : > { %2137 = vmatprep.subr.msk.bf16.mxu0 %vm712_vm4, %v1453_v42  ;;  %v1916_v42 = vld [vmem:[%s2639_s8] ss:$0 sm:$0xff] }
 0x8bb   : > { %2085 = vmatmul.mubr.msk.bf16.vlgmr.msra.gmra.mrb[20].mxu0 %vm665_vm3, %v1390_v41 }
 0x8bc   : > { %2089 = vmatpush3.bf16.msra.mxu0 %v1463_v44 }
 0x986   : > { %v2070_v45 = vpop.f32.mrb[16].mxu0 }
 0x987   : > { %v1284_v46 = vadd.f32 %v2070_v45, %v2504_v38  ;;  %v1268_v47 = vpop.f32.mrb[17].mxu0 }
 0x988   : > { %v1282_v48 = vadd.f32 %v1268_v47, %v2506_v40  ;;  %v2071_v49 = vpop.f32.mrb[18].mxu0  ;;  %v1914_v40 = vld [vmem:[%s2637_s6] ss:$0 sm:$0xff] }
 0x989   : > { %v1271_v50 = vpop.f32.mrb[19].mxu0 }
 0x98a   : > { %v1283_v51 = vadd.f32 %v1271_v50, %v2508_v43 }
 0x98e   : > { %v2086_v52 = vpop.f32.mrb[20].mxu0 }
 0x98f   : > { %v1439_v53 = vpop.f32.mrb[21].mxu0  ;;  %v1455_v57 = vpack.c.bf16 %v2086_v52, %v2086_v52 }
 0x990   : > { %v2087_v55 = vpop.f32.mrb[22].mxu0 }
 0x991   : > { %v1442_v56 = vpop.f32.mrb[23].mxu0  ;;  %v2163_v55 = vld [vmem:[%s2642_s11 + $0x8] sm:$0xff]  }
 0x992   : > { %v1454_v17 = vpack.c.bf16 %v1442_v56, %v1439_v53  ;;  %v2162_v53 = vld [vmem:[%s2642_s11] sm:$0xff]   ;;  %v2164_v56 = vld [vmem:[%s2642_s11 + $0x10] sm:$0xff]  }
 0x993   : > { %2102 = vmatprep.subr.bf16.mxu0 %v2162_v53 }
 0x994   : > { %2090 = vmatprep.mubr.msk.bf16.mxu0 %vm601_vm1, %v1454_v17  ;;  %v2165_v17 = vld [vmem:[%s2642_s11 + $0x18] sm:$0xff]  }
 0x995   : > { %2091 = vmatmul.mubr.msk.bf16.vlgmr.msra.gmra.mrb[24].mxu0 %vm601_vm1, %v1455_v57  ;;  %v2166_v57 = vld [vmem:[%s2642_s11 + $0x20] sm:$0xff]  }
 0x996   : > { %2103 = vmatpush3.bf16.msra.mxu0 %v2162_v53 }
 0x997   : > { %2104 = vmatprep.subr.bf16.mxu0 %v2163_v55 }
 0x99a   : > { %2105 = vmatpush3.bf16.msra.mxu0 %v2163_v55 }
 0x99b   : > { %2106 = vmatprep.subr.bf16.mxu0 %v2164_v56 }
 0x99e   : > { %2107 = vmatpush3.bf16.msra.mxu0 %v2164_v56 }
 0x99f   : > { %2108 = vmatprep.subr.bf16.mxu0 %v2165_v17 }
 0x9a2   : > { %2109 = vmatpush3.bf16.msra.mxu0 %v2165_v17 }
 0x9a3   : > { %2110 = vmatprep.subr.bf16.mxu0 %v2166_v57 }
 0x9a6   : > { %2111 = vmatpush3.bf16.msra.mxu0 %v2166_v57 }
 0xa68   : > { %v2092_v58 = vpop.f32.mrb[24].mxu0 }
 0xa69   : > { %v1515_v61 = vadd.f32 %v2092_v58, %v1284_v46  ;;  %v1499_v38 = vpop.f32.mrb[25].mxu0  ;;  %v2167_v58 = vld [vmem:[%s2642_s11 + $0x28] sm:$0xff]  }
 0xa6a   : > { %v1513_v63 = vadd.f32 %v1499_v38, %v1282_v48  ;;  %v2093_v3 = vpop.f32.mrb[26].mxu0  ;;  %2112 = vmatprep.subr.bf16.mxu0 %v2167_v58  ;;  %v2169_v38 = vld [vmem:[%s2642_s11 + $0x38] sm:$0xff]  }
 0xa6b   : > { %v1502_v43 = vpop.f32.mrb[27].mxu0  ;;  %v1518_v6 = vadd.f32 %v1515_v61, %v2349_v1  ;;  %2113 = vmatpush3.bf16.msra.mxu0 %v2167_v58  ;;  %v2168_v61 = vld [vmem:[%s2642_s11 + $0x30] sm:$0xff]  }
 0xa6c   : > { %v1516_v4 = vadd.f32 %v1513_v63, %v2347_v0  ;;  %v1514_v5 = vadd.f32 %v1502_v43, %v1283_v51  ;;  %2114 = vmatprep.subr.bf16.mxu0 %v2168_v61  ;;  %v1917_v63 = vld [vmem:[%s2641_s10] ss:$0 sm:$0xff] }
 0xa6d   : > { %v2561_v11 = vadd.f32 %v1914_v40, %v1518_v6 }
 0xa6e   : > { %v2554_v7 = vadd.f32 %v1914_v40, %v1516_v4  ;;  %v1517_v8 = vadd.f32 %v1514_v5, %v2351_v2 }
 0xa6f   : > { %v1537_v0 = vsel %vm447_vm0, %v2561_v11, 0.0  ;;  %2115 = vmatpush3.bf16.msra.mxu0 %v2168_v61 }
 0xa70   : > { %v2557_v9 = vadd.f32 %v1914_v40, %v1517_v8  ;;  %v1531_v10 = vsel %vm447_vm0, %v2554_v7, 0.0  ;;  %2116 = vmatprep.subr.bf16.mxu0 %v2169_v38 }
 0xa71   : > { %1532 = vadd.xlane.f32.xlu1 %v1531_v10 }
 0xa72   : > { %v1534_v12 = vsel %vm447_vm0, %v2557_v9, 0.0 }
 0xa73   : > { %1535 = vadd.xlane.f32.xlu0 %v1534_v12  ;;  %2117 = vmatpush3.bf16.msra.mxu0 %v2169_v38 }
 0xa77   : > { %1538 = vadd.xlane.f32.xlu0 %v1537_v0 }
 0xafe   : > { %v1533_v1 = vpop.xlane.xlu1 %1532 }
 0xaff   : > { %v1540_v13 = vmul.f32 0.03125, %v1533_v1 }
 0xb00   : > { %v1536_v14 = vpop.xlane.xlu0 %1535 }
 0xb01   : > { %v1543_v2 = vsub.f32 %v2554_v7, %v1540_v13  ;;  %v1541_v15 = vmul.f32 0.03125, %v1536_v14 }
 0xb03   : > { %v1544_v16 = vsub.f32 %v2557_v9, %v1541_v15  ;;  %v1546_v18 = vmul.f32 %v1543_v2, %v1543_v2 }
 0xb04   : > { %v1539_v19 = vpop.xlane.xlu0 %1538 }
 0xb05   : > { %v1542_v20 = vmul.f32 0.03125, %v1539_v19  ;;  %v1549_v21 = vsel %vm447_vm0, %v1546_v18, 0.0  ;;  %v1547_v22 = vmul.f32 %v1544_v16, %v1544_v16 }
 0xb06   : > { %1550 = vadd.xlane.f32.xlu1 %v1549_v21 }
 0xb07   : > { %v1545_v23 = vsub.f32 %v2561_v11, %v1542_v20  ;;  %v1552_v24 = vsel %vm447_vm0, %v1547_v22, 0.0 }
 0xb08   : > { %1553 = vadd.xlane.f32.xlu0 %v1552_v24 }
 0xb09   : > { %v1548_v25 = vmul.f32 %v1545_v23, %v1545_v23 }
 0xb0b   : > { %v1555_v26 = vsel %vm447_vm0, %v1548_v25, 0.0 }
 0xb0c   : > { %1556 = vadd.xlane.f32.xlu1 %v1555_v26 }
 0xb93   : > { %v1551_v29 = vpop.xlane.xlu1 %1550 }
 0xb94   : > { %v1558_v30 = vmul.f32 0.03125, %v1551_v29 }
 0xb95   : > { %v1554_v31 = vpop.xlane.xlu0 %1553 }
 0xb96   : > { %v1561_v32 = vadd.f32 1e-05, %v1558_v30  ;;  %v1559_v33 = vmul.f32 0.03125, %v1554_v31  ;;  %v1933_v30 = vld [vmem:[%s2643_s12] ss:$0 sm:$0xff] }
 0xb98   : > { %2224 = vrsqrt.f32 %v1561_v32  ;;  %v1562_v34 = vadd.f32 1e-05, %v1559_v33 }
 0xb99   : > { %v1557_v35 = vpop.xlane.xlu1 %1556 }
 0xb9a   : > { %2226 = vrsqrt.f32 %v1562_v34  ;;  %v1560_v36 = vmul.f32 0.03125, %v1557_v35 }
 0xb9c   : > { %v1563_v59 = vadd.f32 1e-05, %v1560_v36 }
 0xb9e   : > { %2228 = vrsqrt.f32 %v1563_v59 }
 0xba2   : > { %v2225_v37 = vpop.eup %2224 }
 0xba3   : > { %v1567_v62 = vmul.f32 %v2225_v37, %v1543_v2 }
 0xba4   : > { %v2227_v60 = vpop.eup %2226 }
 0xba5   : > { %v1568_v39 = vmul.f32 %v2227_v60, %v1544_v16  ;;  %v1576_v41 = vmul.f32 %v1915_v54, %v1567_v62 }
 0xba7   : > { %v1577_v44 = vmul.f32 %v1915_v54, %v1568_v39  ;;  %v1585_v47 = vadd.f32 %v1916_v42, %v1576_v41 }
 0xba8   : > { %v2229_v45 = vpop.eup %2228 }
 0xba9   : > { %v1569_v46 = vmul.f32 %v2229_v45, %v1545_v23  ;;  %v1586_v48 = vadd.f32 %v1916_v42, %v1577_v44 }
 0xbab   : > { %v1578_v49 = vmul.f32 %v1915_v54, %v1569_v46  ;;  %v1588_v50 = vpack.c.bf16 %v1586_v48, %v1585_v47 }
 0xbad   : > { %2098 = vmatprep.mubr.msk.bf16.mxu1 %vm447_vm0, %v1588_v50  ;;  %v1587_v51 = vadd.f32 %v1916_v42, %v1578_v49 }
 0xbaf   : > { %v1589_v52 = vpack.c.bf16 %v1587_v51, %v1587_v51 }
 0xbb1   : > { %2099 = vmatmul.mubr.msk.bf16.vlgmr.msra.gmra.mrb[24].mxu1 %vm447_vm0, %v1589_v52 }
 0xc84   : > { %v2100_v3 = vpop.f32.mrb[24].mxu1 }
 0xc85   : > { %v1662_v40 = vadd.f32 %v2100_v3, %v1917_v63  ;;  %v1653_v43 = vpop.f32.mrb[25].mxu1 }
 0xc86   : > { %v1654_v4 = vadd.f32 %v1917_v63, %v1653_v43  ;;  %v2101_v5 = vpop.f32.mrb[26].mxu1 }
 0xc87   : > { %v1924_v6 = vmul.f32 -1.702, %v1662_v40  ;;  %v1656_v8 = vpop.f32.mrb[27].mxu1 }
 0xc88   : > { %v1922_v10 = vmul.f32 -1.702, %v1654_v4  ;;  %v1657_v12 = vadd.f32 %v1917_v63, %v1656_v8 }
 0xc89   : > { %v1677_v0 = vmul.f32 1.442695, %v1924_v6 }
 0xc8a   : > { %v1673_v1 = vmul.f32 1.442695, %v1922_v10  ;;  %v1923_v13 = vmul.f32 -1.702, %v1657_v12 }
 0xc8b   : > { %2230 = vpow2.f32 %v1677_v0 }
 0xc8c   : > { %2232 = vpow2.f32 %v1673_v1  ;;  %v1675_v14 = vmul.f32 1.442695, %v1923_v13 }
 0xc8e   : > { %2234 = vpow2.f32 %v1675_v14 }
 0xc95   : > { %v2231_v2 = vpop.eup %2230 }
 0xc96   : > { %v2233_v15 = vpop.eup %2232  ;;  %v1681_v16 = vadd.f32 1.0, %v2231_v2 }
 0xc97   : > { %v1679_v18 = vadd.f32 1.0, %v2233_v15 }
 0xc98   : > { %v2235_v19 = vpop.eup %2234  ;;  %2236 = vrcp.f32 %v1681_v16 }
 0xc99   : > { %2238 = vrcp.f32 %v1679_v18  ;;  %v1680_v20 = vadd.f32 1.0, %v2235_v19 }
 0xc9b   : > { %2240 = vrcp.f32 %v1680_v20 }
 0xca2   : > { %v2237_v21 = vpop.eup %2236 }
 0xca3   : > { %v2239_v22 = vpop.eup %2238  ;;  %v1690_v24 = vmul.f32 %v2237_v21, %v1662_v40 }
 0xca4   : > { %v1688_v25 = vmul.f32 %v2239_v22, %v1654_v4 }
 0xca5   : > { %v2241_v23 = vpop.eup %2240  ;;  %v1692_v28 = vpack.c.bf16 %v1690_v24, %v1690_v24 }
 0xca6   : > { %v1689_v26 = vmul.f32 %v2241_v23, %v1657_v12 }
 0xca8   : > { %v1691_v27 = vpack.c.bf16 %v1689_v26, %v1688_v25 }
 0xcaa   : > { %2118 = vmatprep.mubr.bf16.mxu0 %v1691_v27 }
 0xcab   : > { %2119 = vmatmul.mubr.bf16.vlgmr.msra.gmra.mrb[28].mxu0 %v1692_v28 }
 0xd7e   : > { %v2120_v29 = vpop.f32.mrb[28].mxu0 }
 0xd7f   : > { %v1807_v31 = vadd.f32 %v2120_v29, %v2561_v11  ;;  %v1791_v32 = vpop.f32.mrb[29].mxu0 }
 0xd80   : > { %v1805_v33 = vadd.f32 %v1791_v32, %v2554_v7  ;;  %v2121_v34 = vpop.f32.mrb[30].mxu0 }
 0xd81   : > { %v1817_v35 = vadd.f32 %v1933_v30, %v1807_v31  ;;  %v1794_v36 = vpop.f32.mrb[31].mxu0 }
 0xd82   : > { %v1815_v59 = vadd.f32 %v1933_v30, %v1805_v33  ;;  %v1806_v37 = vadd.f32 %v1794_v36, %v2557_v9 }
 0xd83   : > { %1820 = vst.msk [vmem:[%s440_s19 + $0x10] sm:$0xff] %vm447_vm0, %v1817_v35 }
 0xd84   : > { %1818 = vst.msk [vmem:[%s440_s19] sm:$0xff] %vm447_vm0, %v1815_v59  ;;  %v1816_v54 = vadd.f32 %v1933_v30, %v1806_v37 }
 0xd86   : > { %1819 = vst.msk [vmem:[%s440_s19 + $0x8] sm:$0xff] %vm447_vm0, %v1816_v54 }
 0xd87 PF: > { %s23_s25 = sadd.s32 1, %s2248_s25  }
 0xd88   : > { %p20_p4 = scmp.ge.s32.totalorder %s23_s25, 4  }
 0xd8a   :  { %22 = sbr.rel (!%p20_p4) target bundleno = 1 (0x1), region = 102 }

</bundles_post_ra>
